<compile_context>
chip_gen: v7x
topology: tpu7x:2x2x1
jax: 0.10.0
libtpu: 0.0.40
codegen_flags: <defaults>
</compile_context>

<pallas_src>
import functools

import jax
import jax.numpy as jnp
from jax import lax
from jax.experimental import pallas as pl
from jax.experimental.pallas import tpu as pltpu


def _elu(x):
    # ELU(x) = x for x > 0, exp(x) - 1 for x <= 0.  min() keeps the inactive
    # branch finite; single EUP transcendental per element.
    return jnp.where(x > 0.0, x, jnp.exp(jnp.minimum(x, 0.0)) - 1.0)


def _read_unit_kernel(mp_ref, ctrl_ref, know_ref,
                      wk_ref, bk_ref,
                      wci_ref, wck_ref, bc_ref,
                      wc2_ref, bc2_ref,
                      wa_ref,
                      out_ref,
                      weff_scr, m_scr, l_scr, acc_scr):
    """One (batch b, knowledge-base tile k) grid point of the fused ReadUnit.

    mp block: [1,D,1] f32 (pre-projected memory, as a column for row-scaling)
    ctrl block: [1,1,D] f32      know block: [1,tk,D] (bf16 fast / f32 exact)
    weights: [D,D] (bf16/f32), biases [1,D] f32, wa [D,1].
    out block [1,1,D] is revisited across k and written at the last k tile.
    Scratch: W_eff [D,D]; online-softmax running max/sum [1,1]; acc [1,D] f32.
    """
    k = pl.program_id(1)
    cdt = wk_ref.dtype                      # MXU operand dtype (bf16 or f32)

    @pl.when(k == 0)
    def _init():
        # Fold the `interactions` branch into a per-batch effective weight:
        #   inter @ Wci + kp @ Wck == kp @ (mp[:,None] * Wci + Wck)
        # since inter[i,j] = kp[i,j] * mp[j].  O(D^2) VPU work once per batch
        # replaces one [tk,D]x[D,D] MXU matmul + a [tk,D] multiply per tile.
        mp_col = mp_ref[0]                                           # [D, 1] f32
        weff_scr[...] = (mp_col * wci_ref[...] + wck_ref[...]).astype(cdt)
        m_scr[...] = jnp.full(m_scr.shape, -jnp.inf, jnp.float32)
        l_scr[...] = jnp.zeros(l_scr.shape, jnp.float32)
        acc_scr[...] = jnp.zeros(acc_scr.shape, jnp.float32)

    kb = know_ref[0]                        # [tk, D] bf16 (fast) / f32 (exact)

    # knowledge projection (MXU, f32 accumulation)
    kp = jnp.dot(kb, wk_ref[...], preferred_element_type=jnp.float32) + bk_ref[...]
    # concat([inter, kp], -1) @ Wc  ==  kp @ W_eff   (algebraic fold above)
    x = jnp.dot(kp.astype(cdt), weff_scr[...],
                preferred_element_type=jnp.float32) + bc_ref[...]
    x = _elu(x)
    x = jnp.dot(x.astype(cdt), wc2_ref[...],
                preferred_element_type=jnp.float32) + bc2_ref[...]
    x = _elu(x * ctrl_ref[0])                                        # [tk, D]

    # attention logits (MXU); the Linear's scalar bias cancels in softmax.
    logits = jnp.dot(x.astype(cdt), wa_ref[...],
                     preferred_element_type=jnp.float32)             # [tk, 1]

    # online softmax across knowledge-base tiles
    m_prev = m_scr[...]                                              # [1, 1]
    m_new = jnp.maximum(m_prev, jnp.max(logits, axis=0, keepdims=True))
    alpha = jnp.exp(m_prev - m_new)
    p = jnp.exp(logits - m_new)                                      # [tk, 1]
    l_scr[...] = alpha * l_scr[...] + jnp.sum(p, axis=0, keepdims=True)
    # partial attention-weighted read: p^T @ know -> [1, D] (MXU, reuses `kb`)
    pk = lax.dot_general(p.astype(kb.dtype), kb, (((0,), (0,)), ((), ())),
                         preferred_element_type=jnp.float32)
    acc_scr[...] = alpha * acc_scr[...] + pk
    m_scr[...] = m_new

    @pl.when(k == pl.num_programs(1) - 1)
    def _finalize():
        # Exact divide: once per batch over [1,D]; approx reciprocal saves
        # nothing here and would bias every output element.
        out_ref[0] = (acc_scr[...] / l_scr[...]).astype(out_ref.dtype)


def read_unit_forward(params, memory, know, control, *, block_kb=None,
                      use_bf16=True):
    """Eval-mode ReadUnit.  memory/control: [B, D] f32, know: [B, HW, D] f32."""
    Bb, HW, D = know.shape
    if block_kb is None:
        if HW <= 512:
            block_kb = HW            # single kb tile: full MXU M, 1 grid step
        elif HW % 256 == 0:
            block_kb = 256           # v6e/v7x MXU rows; VMEM-safe at D=512
        elif HW % 128 == 0:
            block_kb = 128           # v5e MXU rows
        else:
            block_kb = HW
    assert HW % block_kb == 0 and (block_kb == HW or block_kb % 8 == 0), (HW, block_kb)
    n_k = HW // block_kb

    f32 = jnp.float32
    wdt = jnp.bfloat16 if use_bf16 else f32

    # Weights as bf16 MXU operands on the fast path; biases stay f32.
    wk = params["kproj_w"].astype(wdt)
    wci = params["concat_w"][:D].astype(wdt)     # rows acting on `interactions`
    wck = params["concat_w"][D:].astype(wdt)     # rows acting on `know_proj`
    wc2 = params["concat2_w"].astype(wdt)
    wa = params["attn_w"].astype(wdt)            # [D, 1]
    bk = params["kproj_b"].reshape(1, D).astype(f32)
    bc = params["concat_b"].reshape(1, D).astype(f32)
    bc2 = params["concat2_b"].reshape(1, D).astype(f32)

    # memory projection hoisted out of the kernel: one batched full-occupancy
    # XLA matmul instead of an M=1 MXU pass per (b,k) grid point; also removes
    # the wm/bm operands (two double-buffered DMAs) from the kernel.
    mem_proj = (memory.astype(f32) @ params["mproj_w"].astype(f32)
                + params["mproj_b"].astype(f32))                     # [B, D]
    mem_proj = mem_proj.reshape(Bb, D, 1)        # column form for the W_eff fold

    ctrl3 = control.astype(f32).reshape(Bb, 1, D)
    # `know` is the only O(B*HW*D) HBM stream: bf16 on the fast path halves its
    # DMA bytes and the double-buffered tile footprint; accumulation stays f32.
    know = know.astype(wdt)

    dd = lambda b, k: (0, 0)   # weights/biases: same block for every grid point

    out = pl.pallas_call(
        _read_unit_kernel,
        out_shape=jax.ShapeDtypeStruct((Bb, 1, D), f32),
        grid=(Bb, n_k),
        in_specs=[
            pl.BlockSpec((1, D, 1), lambda b, k: (b, 0, 0)),          # mem_proj col
            pl.BlockSpec((1, 1, D), lambda b, k: (b, 0, 0)),          # control
            pl.BlockSpec((1, block_kb, D), lambda b, k: (b, k, 0)),   # know tile
            pl.BlockSpec((D, D), dd), pl.BlockSpec((1, D), dd),       # kproj
            pl.BlockSpec((D, D), dd), pl.BlockSpec((D, D), dd),       # concat (split)
            pl.BlockSpec((1, D), dd),
            pl.BlockSpec((D, D), dd), pl.BlockSpec((1, D), dd),       # concat_2
            pl.BlockSpec((D, 1), dd),                                 # attn weight
        ],
        out_specs=pl.BlockSpec((1, 1, D), lambda b, k: (b, 0, 0)),
        scratch_shapes=[
            pltpu.VMEM((D, D), wdt),   # W_eff = mp[:,None]*Wci + Wck (per batch)
            pltpu.VMEM((1, 1), f32),   # online-softmax running max
            pltpu.VMEM((1, 1), f32),   # online-softmax running sum(exp)
            pltpu.VMEM((1, D), f32),   # running attention-weighted read
        ],
        compiler_params=pltpu.CompilerParams(
            # batch axis feeds both TensorCores on v7x; kb axis is a reduction.
            dimension_semantics=("parallel", "arbitrary")),
    )(mem_proj, ctrl3, know, wk, bk, wci, wck, bc, wc2, bc2, wa)
    return out.reshape(Bb, D)


def read_unit_reference(params, memory, know, control):
    """Pure-JAX (XLA) ReadUnit forward, eval mode (all dropout = identity)."""
    kp = know @ params["kproj_w"] + params["kproj_b"]
    mp = memory @ params["mproj_w"] + params["mproj_b"]
    inter = kp * mp[:, None, :]
    x = jnp.concatenate([inter, kp], axis=-1) @ params["concat_w"] + params["concat_b"]
    x = jax.nn.elu(x)
    x = x @ params["concat2_w"] + params["concat2_b"]
    x = jax.nn.elu(x * control[:, None, :])
    logits = (x @ params["attn_w"])[..., 0] + params["attn_b"][0]
    attn = jax.nn.softmax(logits, axis=1)
    return jnp.sum(attn[:, :, None] * know, axis=1)


def init_params(key, D):
    ks = jax.random.split(key, 10)

    def dense(k, fi, fo):
        return jax.random.normal(k, (fi, fo), jnp.float32) / jnp.sqrt(float(fi))

    def bias(k, n):
        return 0.1 * jax.random.normal(k, (n,), jnp.float32)

    return {
        "kproj_w": dense(ks[0], D, D),      "kproj_b": bias(ks[1], D),
        "mproj_w": dense(ks[2], D, D),      "mproj_b": bias(ks[3], D),
        "concat_w": dense(ks[4], 2 * D, D), "concat_b": bias(ks[5], D),
        "concat2_w": dense(ks[6], D, D),    "concat2_b": bias(ks[7], D),
        "attn_w": dense(ks[8], D, 1),       "attn_b": bias(ks[9], 1),
    }


if __name__ == "__main__":
    B, HW, D = 2, 64, 128          # batch, kb positions (8x8 image), module_dim
    key = jax.random.PRNGKey(0)
    k_mem, k_know, k_ctrl, k_par = jax.random.split(key, 4)
    memory = jax.random.normal(k_mem, (B, D), jnp.float32)
    know = jax.random.normal(k_know, (B, HW, D), jnp.float32)
    control = jax.random.normal(k_ctrl, (B, D), jnp.float32)
    params = init_params(k_par, D)

    ref = read_unit_reference(params, memory, know, control)

    # Exact f32 path, default tiling (block_kb = HW -> single kb tile).
    fwd_exact = jax.jit(functools.partial(read_unit_forward, use_bf16=False))
    out_exact = fwd_exact(params, memory, know, control)
    jax.block_until_ready(out_exact)
    assert out_exact.shape == (B, D), out_exact.shape
    err = float(jnp.max(jnp.abs(out_exact - ref)))
    assert err < 2e-4, f"exact-path mismatch vs reference: max abs err = {err}"

    # Exact f32 path with 2 kb tiles to exercise the online-softmax path.
    fwd_tiled = jax.jit(functools.partial(read_unit_forward, block_kb=32,
                                          use_bf16=False))
    out_tiled = fwd_tiled(params, memory, know, control)
    jax.block_until_ready(out_tiled)
    err_t = float(jnp.max(jnp.abs(out_tiled - ref)))
    assert err_t < 2e-4, f"tiled-path mismatch vs reference: max abs err = {err_t}"

    # bf16 fast path (bf16 know + weights, f32 accumulation).  Loose bound: the
    # peaked softmax amplifies bf16 logit error; strict accuracy is asserted on
    # the f32 path above, this is a sanity/regression check.
    fwd_fast = jax.jit(read_unit_forward)
    out_fast = fwd_fast(params, memory, know, control)
    jax.block_until_ready(out_fast)
    assert bool(jnp.all(jnp.isfinite(out_fast)))
    err_f = float(jnp.max(jnp.abs(out_fast - ref)))
    assert err_f < 0.5, f"bf16-path mismatch vs reference: max abs err = {err_f}"

    print("KERNEL_OK")
</pallas_src>

<mosaic_0001>
module attributes {stable_mosaic.version = 11 : i64} {
  func.func @_read_unit_kernel(%arg0: i32, %arg1: i32, %arg2: memref<1x128x1xf32, #tpu.memory_space<vmem>>, %arg3: memref<1x1x128xf32, #tpu.memory_space<vmem>>, %arg4: memref<1x64x128xf32, #tpu.memory_space<vmem>>, %arg5: memref<128x128xf32, #tpu.memory_space<vmem>>, %arg6: memref<1x128xf32, #tpu.memory_space<vmem>>, %arg7: memref<128x128xf32, #tpu.memory_space<vmem>>, %arg8: memref<128x128xf32, #tpu.memory_space<vmem>>, %arg9: memref<1x128xf32, #tpu.memory_space<vmem>>, %arg10: memref<128x128xf32, #tpu.memory_space<vmem>>, %arg11: memref<1x128xf32, #tpu.memory_space<vmem>>, %arg12: memref<128x1xf32, #tpu.memory_space<vmem>>, %arg13: memref<1x1x128xf32, #tpu.memory_space<vmem>>, %arg14: memref<128x128xf32, #tpu.memory_space<vmem>>, %arg15: memref<1x1xf32, #tpu.memory_space<vmem>>, %arg16: memref<1x1xf32, #tpu.memory_space<vmem>>, %arg17: memref<1x128xf32, #tpu.memory_space<vmem>>) attributes {dimension_semantics = [#tpu.dimension_semantics<parallel>, #tpu.dimension_semantics<arbitrary>], iteration_bounds = array<i64: 2, 1>, scalar_prefetch = 0 : i64, scratch_operands = 4 : i64, tpu.core_type = #tpu.core_type<tc>, window_params = [{transform_indices = @transform_0, window_bounds = array<i64: 1, 128, 1>}, {transform_indices = @transform_1, window_bounds = array<i64: 1, 1, 128>}, {transform_indices = @transform_2, window_bounds = array<i64: 1, 64, 128>}, {pipeline_mode = #tpu.pipeline_mode<synchronous>, transform_indices = @transform_3, window_bounds = array<i64: 128, 128>}, {pipeline_mode = #tpu.pipeline_mode<synchronous>, transform_indices = @transform_4, window_bounds = array<i64: 1, 128>}, {pipeline_mode = #tpu.pipeline_mode<synchronous>, transform_indices = @transform_5, window_bounds = array<i64: 128, 128>}, {pipeline_mode = #tpu.pipeline_mode<synchronous>, transform_indices = @transform_6, window_bounds = array<i64: 128, 128>}, {pipeline_mode = #tpu.pipeline_mode<synchronous>, transform_indices = @transform_7, window_bounds = array<i64: 1, 128>}, {pipeline_mode = #tpu.pipeline_mode<synchronous>, transform_indices = @transform_8, window_bounds = array<i64: 128, 128>}, {pipeline_mode = #tpu.pipeline_mode<synchronous>, transform_indices = @transform_9, window_bounds = array<i64: 1, 128>}, {pipeline_mode = #tpu.pipeline_mode<synchronous>, transform_indices = @transform_10, window_bounds = array<i64: 128, 1>}, {transform_indices = @transform_11, window_bounds = array<i64: 1, 1, 128>}]} {
    %c0_i32 = arith.constant 0 : i32
    %0 = arith.cmpi eq, %arg1, %c0_i32 : i32
    %1 = arith.extui %0 : i1 to i32
    %c0_i32_0 = arith.constant 0 : i32
    %2 = arith.cmpi ne, %1, %c0_i32_0 : i32
    scf.if %2 {
      %c0_46 = arith.constant 0 : index
      %c0_47 = arith.constant 0 : index
      %c0_48 = arith.constant 0 : index
      %67 = vector.load %arg2[%c0_46, %c0_47, %c0_48] : memref<1x128x1xf32, #tpu.memory_space<vmem>>, vector<1x128x1xf32>
      %68 = vector.shape_cast %67 : vector<1x128x1xf32> to vector<128x1xf32>
      %c0_49 = arith.constant 0 : index
      %c0_50 = arith.constant 0 : index
      %69 = vector.load %arg7[%c0_49, %c0_50] : memref<128x128xf32, #tpu.memory_space<vmem>>, vector<128x128xf32>
      %70 = vector.broadcast %68 : vector<128x1xf32> to vector<128x128xf32>
      %71 = arith.mulf %70, %69 : vector<128x128xf32>
      %c0_51 = arith.constant 0 : index
      %c0_52 = arith.constant 0 : index
      %72 = vector.load %arg8[%c0_51, %c0_52] : memref<128x128xf32, #tpu.memory_space<vmem>>, vector<128x128xf32>
      %73 = arith.addf %71, %72 : vector<128x128xf32>
      %c0_53 = arith.constant 0 : index
      %c0_54 = arith.constant 0 : index
      %74 = vector.load %arg14[%c0_53, %c0_54] : memref<128x128xf32, #tpu.memory_space<vmem>>, vector<128x128xf32>
      tpu.vector_store %arg14[%c0_53, %c0_54], %73 {strides = array<i32>} : memref<128x128xf32, #tpu.memory_space<vmem>>, vector<128x128xf32>,
      %cst_55 = arith.constant 0xFF800000 : f32
      %75 = vector.broadcast %cst_55 : f32 to vector<1x1xf32>
      %c0_56 = arith.constant 0 : index
      %c0_57 = arith.constant 0 : index
      %76 = vector.load %arg15[%c0_56, %c0_57] : memref<1x1xf32, #tpu.memory_space<vmem>>, vector<1x1xf32>
      tpu.vector_store %arg15[%c0_56, %c0_57], %75 {strides = array<i32>} : memref<1x1xf32, #tpu.memory_space<vmem>>, vector<1x1xf32>,
      %cst_58 = arith.constant 0.000000e+00 : f32
      %77 = vector.broadcast %cst_58 : f32 to vector<1x1xf32>
      %c0_59 = arith.constant 0 : index
      %c0_60 = arith.constant 0 : index
      %78 = vector.load %arg16[%c0_59, %c0_60] : memref<1x1xf32, #tpu.memory_space<vmem>>, vector<1x1xf32>
      tpu.vector_store %arg16[%c0_59, %c0_60], %77 {strides = array<i32>} : memref<1x1xf32, #tpu.memory_space<vmem>>, vector<1x1xf32>,
      %cst_61 = arith.constant 0.000000e+00 : f32
      %79 = vector.broadcast %cst_61 : f32 to vector<1x128xf32>
      %c0_62 = arith.constant 0 : index
      %c0_63 = arith.constant 0 : index
      %80 = vector.load %arg17[%c0_62, %c0_63] : memref<1x128xf32, #tpu.memory_space<vmem>>, vector<1x128xf32>
      tpu.vector_store %arg17[%c0_62, %c0_63], %79 {strides = array<i32>} : memref<1x128xf32, #tpu.memory_space<vmem>>, vector<1x128xf32>,
    } else {
    }
    %c0 = arith.constant 0 : index
    %c0_1 = arith.constant 0 : index
    %c0_2 = arith.constant 0 : index
    %3 = vector.load %arg4[%c0, %c0_1, %c0_2] : memref<1x64x128xf32, #tpu.memory_space<vmem>>, vector<1x64x128xf32>
    %4 = vector.shape_cast %3 : vector<1x64x128xf32> to vector<64x128xf32>
    %c0_3 = arith.constant 0 : index
    %c0_4 = arith.constant 0 : index
    %5 = vector.load %arg5[%c0_3, %c0_4] : memref<128x128xf32, #tpu.memory_space<vmem>>, vector<128x128xf32>
    %cst = arith.constant dense<0.000000e+00> : vector<64x128xf32>
    %6 = tpu.matmul %4, %5, %cst {dimension_numbers = #tpu.dot_dimension_numbers<[1], [0], [0], [1], [0, 0, 1, 1], [], []>} : vector<64x128xf32>, vector<128x128xf32>, vector<64x128xf32> -> vector<64x128xf32>
    %c0_5 = arith.constant 0 : index
    %c0_6 = arith.constant 0 : index
    %7 = vector.load %arg6[%c0_5, %c0_6] : memref<1x128xf32, #tpu.memory_space<vmem>>, vector<1x128xf32>
    %8 = vector.broadcast %7 : vector<1x128xf32> to vector<64x128xf32>
    %9 = arith.addf %6, %8 : vector<64x128xf32>
    %c0_7 = arith.constant 0 : index
    %c0_8 = arith.constant 0 : index
    %10 = vector.load %arg14[%c0_7, %c0_8] : memref<128x128xf32, #tpu.memory_space<vmem>>, vector<128x128xf32>
    %cst_9 = arith.constant dense<0.000000e+00> : vector<64x128xf32>
    %11 = tpu.matmul %9, %10, %cst_9 {dimension_numbers = #tpu.dot_dimension_numbers<[1], [0], [0], [1], [0, 0, 1, 1], [], []>} : vector<64x128xf32>, vector<128x128xf32>, vector<64x128xf32> -> vector<64x128xf32>
    %c0_10 = arith.constant 0 : index
    %c0_11 = arith.constant 0 : index
    %12 = vector.load %arg9[%c0_10, %c0_11] : memref<1x128xf32, #tpu.memory_space<vmem>>, vector<1x128xf32>
    %13 = vector.broadcast %12 : vector<1x128xf32> to vector<64x128xf32>
    %14 = arith.addf %11, %13 : vector<64x128xf32>
    %cst_12 = arith.constant 0.000000e+00 : f32
    %15 = vector.broadcast %cst_12 : f32 to vector<64x128xf32>
    %16 = arith.cmpf ogt, %14, %15 : vector<64x128xf32>
    %cst_13 = arith.constant 0.000000e+00 : f32
    %17 = vector.broadcast %cst_13 : f32 to vector<64x128xf32>
    %18 = arith.minimumf %14, %17 : vector<64x128xf32>
    %19 = math.exp %18 : vector<64x128xf32>
    %cst_14 = arith.constant 1.000000e+00 : f32
    %20 = vector.broadcast %cst_14 : f32 to vector<64x128xf32>
    %21 = arith.subf %19, %20 : vector<64x128xf32>
    %22 = arith.select %16, %14, %21 : vector<64x128xi1>, vector<64x128xf32>
    %c0_15 = arith.constant 0 : index
    %c0_16 = arith.constant 0 : index
    %23 = vector.load %arg10[%c0_15, %c0_16] : memref<128x128xf32, #tpu.memory_space<vmem>>, vector<128x128xf32>
    %cst_17 = arith.constant dense<0.000000e+00> : vector<64x128xf32>
    %24 = tpu.matmul %22, %23, %cst_17 {dimension_numbers = #tpu.dot_dimension_numbers<[1], [0], [0], [1], [0, 0, 1, 1], [], []>} : vector<64x128xf32>, vector<128x128xf32>, vector<64x128xf32> -> vector<64x128xf32>
    %c0_18 = arith.constant 0 : index
    %c0_19 = arith.constant 0 : index
    %25 = vector.load %arg11[%c0_18, %c0_19] : memref<1x128xf32, #tpu.memory_space<vmem>>, vector<1x128xf32>
    %26 = vector.broadcast %25 : vector<1x128xf32> to vector<64x128xf32>
    %27 = arith.addf %24, %26 : vector<64x128xf32>
    %c0_20 = arith.constant 0 : index
    %c0_21 = arith.constant 0 : index
    %c0_22 = arith.constant 0 : index
    %28 = vector.load %arg3[%c0_20, %c0_21, %c0_22] : memref<1x1x128xf32, #tpu.memory_space<vmem>>, vector<1x1x128xf32>
    %29 = vector.shape_cast %28 : vector<1x1x128xf32> to vector<1x128xf32>
    %30 = vector.broadcast %29 : vector<1x128xf32> to vector<64x128xf32>
    %31 = arith.mulf %27, %30 : vector<64x128xf32>
    %cst_23 = arith.constant 0.000000e+00 : f32
    %32 = vector.broadcast %cst_23 : f32 to vector<64x128xf32>
    %33 = arith.cmpf ogt, %31, %32 : vector<64x128xf32>
    %cst_24 = arith.constant 0.000000e+00 : f32
    %34 = vector.broadcast %cst_24 : f32 to vector<64x128xf32>
    %35 = arith.minimumf %31, %34 : vector<64x128xf32>
    %36 = math.exp %35 : vector<64x128xf32>
    %cst_25 = arith.constant 1.000000e+00 : f32
    %37 = vector.broadcast %cst_25 : f32 to vector<64x128xf32>
    %38 = arith.subf %36, %37 : vector<64x128xf32>
    %39 = arith.select %33, %31, %38 : vector<64x128xi1>, vector<64x128xf32>
    %c0_26 = arith.constant 0 : index
    %c0_27 = arith.constant 0 : index
    %40 = vector.load %arg12[%c0_26, %c0_27] : memref<128x1xf32, #tpu.memory_space<vmem>>, vector<128x1xf32>
    %cst_28 = arith.constant dense<0.000000e+00> : vector<64x1xf32>
    %41 = tpu.matmul %39, %40, %cst_28 {dimension_numbers = #tpu.dot_dimension_numbers<[1], [0], [0], [1], [0, 0, 1, 1], [], []>} : vector<64x128xf32>, vector<128x1xf32>, vector<64x1xf32> -> vector<64x1xf32>
    %c0_29 = arith.constant 0 : index
    %c0_30 = arith.constant 0 : index
    %42 = vector.load %arg15[%c0_29, %c0_30] : memref<1x1xf32, #tpu.memory_space<vmem>>, vector<1x1xf32>
    %cst_31 = arith.constant dense<0xFF800000> : vector<1xf32>
    %43 = vector.multi_reduction <maximumf>, %41, %cst_31 [0] : vector<64x1xf32> to vector<1xf32>
    %44 = vector.shape_cast %43 : vector<1xf32> to vector<1x1xf32>
    %45 = arith.maximumf %42, %44 : vector<1x1xf32>
    %46 = arith.subf %42, %45 : vector<1x1xf32>
    %47 = math.exp %46 : vector<1x1xf32>
    %48 = vector.broadcast %45 : vector<1x1xf32> to vector<64x1xf32>
    %49 = arith.subf %41, %48 : vector<64x1xf32>
    %50 = math.exp %49 : vector<64x1xf32>
    %c0_32 = arith.constant 0 : index
    %c0_33 = arith.constant 0 : index
    %51 = vector.load %arg16[%c0_32, %c0_33] : memref<1x1xf32, #tpu.memory_space<vmem>>, vector<1x1xf32>
    %52 = arith.mulf %47, %51 : vector<1x1xf32>
    %cst_34 = arith.constant dense<0.000000e+00> : vector<1xf32>
    %53 = vector.multi_reduction <add>, %50, %cst_34 [0] : vector<64x1xf32> to vector<1xf32>
    %54 = vector.shape_cast %53 : vector<1xf32> to vector<1x1xf32>
    %55 = arith.addf %52, %54 : vector<1x1xf32>
    %c0_35 = arith.constant 0 : index
    %c0_36 = arith.constant 0 : index
    %56 = vector.load %arg16[%c0_35, %c0_36] : memref<1x1xf32, #tpu.memory_space<vmem>>, vector<1x1xf32>
    tpu.vector_store %arg16[%c0_35, %c0_36], %55 {strides = array<i32>} : memref<1x1xf32, #tpu.memory_space<vmem>>, vector<1x1xf32>,
    %cst_37 = arith.constant dense<0.000000e+00> : vector<1x128xf32>
    %57 = tpu.matmul %50, %4, %cst_37 {dimension_numbers = #tpu.dot_dimension_numbers<[0], [0], [1], [1], [0, 1, 1, 1], [], []>} : vector<64x1xf32>, vector<64x128xf32>, vector<1x128xf32> -> vector<1x128xf32>
    %c0_38 = arith.constant 0 : index
    %c0_39 = arith.constant 0 : index
    %58 = vector.load %arg17[%c0_38, %c0_39] : memref<1x128xf32, #tpu.memory_space<vmem>>, vector<1x128xf32>
    %59 = vector.broadcast %47 : vector<1x1xf32> to vector<1x128xf32>
    %60 = arith.mulf %59, %58 : vector<1x128xf32>
    %61 = arith.addf %60, %57 : vector<1x128xf32>
    %c0_40 = arith.constant 0 : index
    %c0_41 = arith.constant 0 : index
    %62 = vector.load %arg17[%c0_40, %c0_41] : memref<1x128xf32, #tpu.memory_space<vmem>>, vector<1x128xf32>
    tpu.vector_store %arg17[%c0_40, %c0_41], %61 {strides = array<i32>} : memref<1x128xf32, #tpu.memory_space<vmem>>, vector<1x128xf32>,
    %c0_42 = arith.constant 0 : index
    %c0_43 = arith.constant 0 : index
    %63 = vector.load %arg15[%c0_42, %c0_43] : memref<1x1xf32, #tpu.memory_space<vmem>>, vector<1x1xf32>
    tpu.vector_store %arg15[%c0_42, %c0_43], %45 {strides = array<i32>} : memref<1x1xf32, #tpu.memory_space<vmem>>, vector<1x1xf32>,
    %c0_i32_44 = arith.constant 0 : i32
    %64 = arith.cmpi eq, %arg1, %c0_i32_44 : i32
    %65 = arith.extui %64 : i1 to i32
    %c0_i32_45 = arith.constant 0 : i32
    %66 = arith.cmpi ne, %65, %c0_i32_45 : i32
    scf.if %66 {
      %c0_46 = arith.constant 0 : index
      %c0_47 = arith.constant 0 : index
      %67 = vector.load %arg17[%c0_46, %c0_47] : memref<1x128xf32, #tpu.memory_space<vmem>>, vector<1x128xf32>
      %c0_48 = arith.constant 0 : index
      %c0_49 = arith.constant 0 : index
      %68 = vector.load %arg16[%c0_48, %c0_49] : memref<1x1xf32, #tpu.memory_space<vmem>>, vector<1x1xf32>
      %69 = vector.broadcast %68 : vector<1x1xf32> to vector<1x128xf32>
      %70 = arith.divf %67, %69 : vector<1x128xf32>
      %c0_50 = arith.constant 0 : index
      %c0_51 = arith.constant 0 : index
      %c0_52 = arith.constant 0 : index
      %71 = vector.load %arg13[%c0_50, %c0_51, %c0_52] : memref<1x1x128xf32, #tpu.memory_space<vmem>>, vector<1x1x128xf32>
      %72 = vector.shape_cast %71 : vector<1x1x128xf32> to vector<1x128xf32>
      %73 = vector.shape_cast %70 : vector<1x128xf32> to vector<1x1x128xf32>
      tpu.vector_store %arg13[%c0_50, %c0_51, %c0_52], %73 {strides = array<i32>} : memref<1x1x128xf32, #tpu.memory_space<vmem>>, vector<1x1x128xf32>,
    } else {
    }
    return
  }
  func.func @transform_0(%arg0: i32, %arg1: i32) -> (i32, i32, i32) {
    %c0_i32 = arith.constant 0 : i32
    %c0_i32_0 = arith.constant 0 : i32
    %c0_i32_1 = arith.constant 0 : i32
    return %arg0, %c0_i32, %c0_i32_0 : i32, i32, i32
  }
  func.func @transform_1(%arg0: i32, %arg1: i32) -> (i32, i32, i32) {
    %c0_i32 = arith.constant 0 : i32
    %c0_i32_0 = arith.constant 0 : i32
    %c0_i32_1 = arith.constant 0 : i32
    return %arg0, %c0_i32, %c0_i32_0 : i32, i32, i32
  }
  func.func @transform_2(%arg0: i32, %arg1: i32) -> (i32, i32, i32) {
    %c0_i32 = arith.constant 0 : i32
    %c0_i32_0 = arith.constant 0 : i32
    return %arg0, %arg1, %c0_i32 : i32, i32, i32
  }
  func.func @transform_3(%arg0: i32, %arg1: i32) -> (i32, i32) {
    %c0_i32 = arith.constant 0 : i32
    %c0_i32_0 = arith.constant 0 : i32
    %c0_i32_1 = arith.constant 0 : i32
    return %c0_i32, %c0_i32_0 : i32, i32
  }
  func.func @transform_4(%arg0: i32, %arg1: i32) -> (i32, i32) {
    %c0_i32 = arith.constant 0 : i32
    %c0_i32_0 = arith.constant 0 : i32
    %c0_i32_1 = arith.constant 0 : i32
    return %c0_i32, %c0_i32_0 : i32, i32
  }
  func.func @transform_5(%arg0: i32, %arg1: i32) -> (i32, i32) {
    %c0_i32 = arith.constant 0 : i32
    %c0_i32_0 = arith.constant 0 : i32
    %c0_i32_1 = arith.constant 0 : i32
    return %c0_i32, %c0_i32_0 : i32, i32
  }
  func.func @transform_6(%arg0: i32, %arg1: i32) -> (i32, i32) {
    %c0_i32 = arith.constant 0 : i32
    %c0_i32_0 = arith.constant 0 : i32
    %c0_i32_1 = arith.constant 0 : i32
    return %c0_i32, %c0_i32_0 : i32, i32
  }
  func.func @transform_7(%arg0: i32, %arg1: i32) -> (i32, i32) {
    %c0_i32 = arith.constant 0 : i32
    %c0_i32_0 = arith.constant 0 : i32
    %c0_i32_1 = arith.constant 0 : i32
    return %c0_i32, %c0_i32_0 : i32, i32
  }
  func.func @transform_8(%arg0: i32, %arg1: i32) -> (i32, i32) {
    %c0_i32 = arith.constant 0 : i32
    %c0_i32_0 = arith.constant 0 : i32
    %c0_i32_1 = arith.constant 0 : i32
    return %c0_i32, %c0_i32_0 : i32, i32
  }
  func.func @transform_9(%arg0: i32, %arg1: i32) -> (i32, i32) {
    %c0_i32 = arith.constant 0 : i32
    %c0_i32_0 = arith.constant 0 : i32
    %c0_i32_1 = arith.constant 0 : i32
    return %c0_i32, %c0_i32_0 : i32, i32
  }
  func.func @transform_10(%arg0: i32, %arg1: i32) -> (i32, i32) {
    %c0_i32 = arith.constant 0 : i32
    %c0_i32_0 = arith.constant 0 : i32
    %c0_i32_1 = arith.constant 0 : i32
    return %c0_i32, %c0_i32_0 : i32, i32
  }
  func.func @transform_11(%arg0: i32, %arg1: i32) -> (i32, i32, i32) {
    %c0_i32 = arith.constant 0 : i32
    %c0_i32_0 = arith.constant 0 : i32
    %c0_i32_1 = arith.constant 0 : i32
    return %arg0, %c0_i32, %c0_i32_0 : i32, i32, i32
  }
}

</mosaic_0001>

<bundles_post_ra>
// kernel: read_unit_forward.1
= control target key start
LH: loop header
LB: loop body
LE: loop exit
PB: predicated region body
PF: predicated region fallthrough
CT: control target
= control target key end

     0   :  { %16 = vsyncpa [#allocation7], 0  ;;  %s2774_s0 = inlined_call_operand.vmem [shape: f32[2,128,1], index: 0, kind: input, shape index: {}]   ;;  %s2775_s1 = inlined_call_operand.vmem [shape: f32[2,1,128], index: 1, kind: input, shape index: {}]   ;;  %s2776_s2 = inlined_call_operand.vmem [shape: f32[2,64,128], index: 2, kind: input, shape index: {}]   ;;  %s2777_s3 = inlined_call_operand.vmem [shape: f32[128,128], index: 3, kind: input, shape index: {}]   ;;  %s2778_s4 = inlined_call_operand.vmem [shape: f32[1,128], index: 4, kind: input, shape index: {}]   ;;  %s2779_s5 = inlined_call_operand.vmem [shape: f32[128,128], index: 5, kind: input, shape index: {}]   ;;  %s2780_s6 = inlined_call_operand.vmem [shape: f32[128,128], index: 6, kind: input, shape index: {}]   ;;  %s2781_s7 = inlined_call_operand.vmem [shape: f32[1,128], index: 7, kind: input, shape index: {}]   ;;  %s2782_s8 = inlined_call_operand.vmem [shape: f32[128,128], index: 8, kind: input, shape index: {}]   ;;  %s2783_s9 = inlined_call_operand.vmem [shape: f32[1,128], index: 9, kind: input, shape index: {}]   ;;  %s2784_s10 = inlined_call_operand.vmem [shape: f32[128,1], index: 10, kind: input, shape index: {}]   ;;  %s2785_s11 = inlined_call_operand.hbm [shape: f32[2,1,128], index: 11, kind: output, shape index: {}]  }
   0x1   :  { %18 = vsyncpa [#allocation7 + $0x1], 0  ;;  %s2312_s17 = smov 0   ;;  %s2314_s18 = smov 0  }
   0x2   :  { %s2316_s19 = smov 0   ;;  %s2318_s20 = smov 0  }
   0x3   :  { %s2320_s21 = smov 0   ;;  %s2322_s22 = smov 0  }
   0x4 LB: > { %2789 = sst [smem:[#allocation9_spill]] %s2232_s19  ;;  %s1577_s23 = sadd.s32 4294967295, %s2244_s22   ;;  %s2244_s22 = sphi %s2322_s22, %s24_s22   ;;  %s2240_s21 = sphi %s2320_s21, %s2798_s21   ;;  %s2236_s20 = sphi %s2318_s20, %s2801_s20   ;;  %s2232_s19 = sphi %s2316_s19, %s2796_s19   ;;  %s2228_s18 = sphi %s2314_s18, %s2800_s18   ;;  %s2224_s17 = sphi %s2312_s17, %s2799_s17  }
   0x5   : > { %2790 = sst [smem:[#allocation10_spill]] %s2240_s21  ;;  %s1578_s24 = sadd.s32 4294967294, %s2244_s22  }
   0x6   : > { %s36_s25 = sadd.s32 1, %s2240_s21  ;;  %s291_s26 = sadd.s32 1, %s2232_s19 }
   0x7   : > { %p38_p0 = scmp.ge.s32.totalorder %s36_s25, 2  ;;  %p301_p1 = scmp.ne.s32.totalorder %s2232_s19, %s2228_s18 }
   0x8   : > { %p302_p2 = scmp.eq.s32.totalorder %s1577_s23, 1  ;;  %p307_p3 = scmp.ne.s32.totalorder %s2228_s18, %s2224_s17 }
   0x9   : > { %s2803_s25 = smov (%p38_p0, %s36_s25), 0  ;;  %p308_p5 = scmp.eq.s32.totalorder %s1578_s24, 1 }
   0xa   : > { %2791 = sst [smem:[#allocation11_spill]] %s2803_s25  ;;  %p2352_p4 = por %p302_p2, %p301_p1 }
   0xb   : > { %s288_s28 = ssub.s32 %s2240_s21, %s2803_s25  ;;  %p1581_p6 = scmp.ge.s32.totalorder %s2244_s22, 1 }
   0xc   : > { %p289_p7 = scmp.eq.s32.totalorder %s288_s28, 0  ;;  %p2359_p8 = por %p308_p5, %p307_p3 }
   0xd   : > { %p377_p9 = scmp.lt.s32.totalorder %s2244_s22, 3 }
   0xe   : > { %s2365_s30 = scalar_select %p289_p7, %s2232_s19, %s291_s26  }
   0xf   : > { %p378_p10 = pnand %p1581_p6, %p377_p9 }
  0x10   : > { %2794 = sst [smem:[#allocation12_spill]] %s2365_s30  ;;  %v638_v0 = vld [vmem:[%s2777_s3] sm:$0xff] (!%p378_p10)  ;;  %v639_v1 = vld [vmem:[%s2777_s3 + $0x8] sm:$0xff] (!%p378_p10)  ;;  %v640_v2 = vld [vmem:[%s2777_s3 + $0x10] sm:$0xff] (!%p378_p10)  ;;  %p428_p11 = scmp.lt.s32.totalorder (!%p378_p10), %s2236_s20, 1  ;;  %v2246_v5 = vmov (!%p378_p10), 0  }
  0x11   : > { %381 = sbr.rel (%p378_p10) target bundleno = 1367 (0x557), region = 64  ;;  %v1912_v3 = vpack.c.bf16 (!%p378_p10), %v639_v1, %v638_v0  ;;  %v641_v4 = vld [vmem:[%s2777_s3 + $0x18] sm:$0xff] (!%p378_p10)  ;;  %2112 = vset.pattern.permute.xlu0 (!%p378_p10), %v2246_v5  ;;  %2113 = vset.pattern.permute.xlu1 (!%p378_p10), %v2246_v5  ;;  %v642_v7 = vld [vmem:[%s2777_s3 + $0x20] sm:$0xff] (!%p378_p10)  ;;  %v643_v8 = vld [vmem:[%s2777_s3 + $0x28] sm:$0xff] (!%p378_p10)  ;;  %s1607_s13 = sshll.u32 (!%p378_p10), %s2236_s20, 4 }
  0x12   : > { %v1916_v6 = vpack.c.bf16 (!%p378_p10), %v641_v4, %v640_v2  ;;  %v1920_v9 = vpack.c.bf16 (!%p378_p10), %v643_v8, %v642_v7  ;;  %v644_v10 = vld [vmem:[%s2777_s3 + $0x30] sm:$0xff] (!%p378_p10)  ;;  %v645_v11 = vld [vmem:[%s2777_s3 + $0x38] sm:$0xff] (!%p378_p10)  ;;  %v646_v27 = vld [vmem:[%s2777_s3 + $0x40] sm:$0xff] (!%p378_p10) }
  0x13   : > { %1913 = vmatprep.subr.bf16.mxu0 (!%p378_p10), %v1912_v3  ;;  %v1924_v24 = vpack.c.bf16 (!%p378_p10), %v645_v11, %v644_v10  ;;  %v647_v28 = vld [vmem:[%s2777_s3 + $0x48] sm:$0xff] (!%p378_p10)  ;;  %v648_v32 = vld [vmem:[%s2777_s3 + $0x50] sm:$0xff] (!%p378_p10)  ;;  %v649_v33 = vld [vmem:[%s2777_s3 + $0x58] sm:$0xff] (!%p378_p10) }
  0x14   : > { %1915 = vmatpush3.bf16.msra.mxu0 (!%p378_p10), %v1912_v3  ;;  %v1928_v31 = vpack.c.bf16 (!%p378_p10), %v647_v28, %v646_v27  ;;  %v1932_v36 = vpack.c.bf16 (!%p378_p10), %v649_v33, %v648_v32  ;;  %v650_v37 = vld [vmem:[%s2777_s3 + $0x60] sm:$0xff] (!%p378_p10)  ;;  %v651_v38 = vld [vmem:[%s2777_s3 + $0x68] sm:$0xff] (!%p378_p10)  ;;  %v652_v42 = vld [vmem:[%s2777_s3 + $0x70] sm:$0xff] (!%p378_p10) }
  0x15   : > { %1917 = vmatprep.subr.bf16.mxu0 (!%p378_p10), %v1916_v6  ;;  %v1936_v41 = vpack.c.bf16 (!%p378_p10), %v651_v38, %v650_v37  ;;  %v653_v43 = vld [vmem:[%s2777_s3 + $0x78] sm:$0xff] (!%p378_p10)  ;;  %v466_v53 = vld [vmem:[%s2779_s5] sm:$0xff] (!%p378_p10)  ;;  %v468_v54 = vld [vmem:[%s2779_s5 + $0x10] sm:$0xff] (!%p378_p10) }
  0x16   : > { %v1940_v46 = vpack.c.bf16 (!%p378_p10), %v653_v43, %v652_v42  ;;  %v942_v55 = vld [vmem:[%s2782_s8] sm:$0xff] (!%p378_p10)  ;;  %v943_v56 = vld [vmem:[%s2782_s8 + $0x8] sm:$0xff] (!%p378_p10)  ;;  %v944_v57 = vld [vmem:[%s2782_s8 + $0x10] sm:$0xff] (!%p378_p10) }
  0x17   : > { %v1976_v59 = vpack.c.bf16 (!%p378_p10), %v943_v56, %v942_v55  ;;  %v945_v60 = vld [vmem:[%s2782_s8 + $0x18] sm:$0xff] (!%p378_p10)  ;;  %v946_v0 = vld [vmem:[%s2782_s8 + $0x20] sm:$0xff] (!%p378_p10)  ;;  %v947_v1 = vld [vmem:[%s2782_s8 + $0x28] sm:$0xff] (!%p378_p10) }
  0x18   : > { %s2387_s15 = scalar_select %p428_p11, %s2236_s20, 1  ;;  %1919 = vmatpush3.bf16.msra.mxu0 %v1916_v6  ;;  %v1980_v63 = vpack.c.bf16 %v945_v60, %v944_v57  ;;  %v578_v2 = vld [vmem:[%s2780_s6] sm:$0xff]  ;;  %v467_v4 = vld [vmem:[%s2779_s5 + $0x8] sm:$0xff]  ;;  %v580_v5 = vld [vmem:[%s2780_s6 + $0x10] sm:$0xff] }
  0x19   : > { %1921 = vmatprep.subr.bf16.mxu0 %v1920_v9  ;;  %v469_v6 = vld [vmem:[%s2779_s5 + $0x18] sm:$0xff]  ;;  %v579_v7 = vld [vmem:[%s2780_s6 + $0x8] sm:$0xff]  ;;  %v470_v28 = vld [vmem:[%s2779_s5 + $0x20] sm:$0xff]  ;;  %s2251_s20 = smov [#allocation6]  }
  0x1a   : > { %s1610_s16 = sshll.u32 %s2387_s15, 7  ;;  %s1611_s23 = sshll.u32 %s2387_s15, 6  ;;  %v582_v32 = vld [vmem:[%s2780_s6 + $0x20] sm:$0xff]  ;;  %v473_v42 = vld [vmem:[%s2779_s5 + $0x38] sm:$0xff]  ;;  %v587_v57 = vld [vmem:[%s2780_s6 + $0x48] sm:$0xff] }
  0x1b   : > { %s2400_s25 = scalar_lea.vmem %s2774_s0, %s1610_s16  ;;  %s444_s19 = scalar_lea.vmem %s2776_s2, %s1611_s23  ;;  %v586_v55 = vld [vmem:[%s2780_s6 + $0x40] sm:$0xff] }
  0x1c   : > { %v2405_v12 = vld [vmem:[%s444_s19] sm:$0xff]  ;;  %v2407_v13 = vld [vmem:[%s444_s19 + $0x8] sm:$0xff]  ;;  %v2409_v14 = vld [vmem:[%s444_s19 + $0x10] sm:$0xff]  ;;  %1923 = vmatpush3.bf16.msra.mxu0 %v1920_v9  ;;  %v1984_v9 = vpack.c.bf16 %v947_v1, %v946_v0  ;;  %s435_s28 = scalar_lea.vmem %s2775_s1, %s2387_s15  ;;  %s426_s15 = sand.u32 1, %s2228_s18  }
  0x1d   : > { %1749 = vmatprep.mubr.f32.mxu0 %v2405_v12  ;;  %v2041_v15 = vpack.c.bf16 %v2407_v13, %v2405_v12  ;;  %v2414_v16 = vld [vmem:[%s444_s19 + $0x18] sm:$0xff]  ;;  %v2416_v17 = vld [vmem:[%s444_s19 + $0x20] sm:$0xff]  ;;  %v2418_v18 = vld [vmem:[%s444_s19 + $0x28] sm:$0xff]  ;;  %1925 = vmatprep.subr.bf16.mxu0 %v1924_v24  ;;  %s427_s14 = scalar_lea.vmem [#allocation6], %s426_s15  ;;  %s2727_s23 = scalar_lea.hbm %s2785_s11, %s1607_s13 }
  0x1e   : > { %v2044_v19 = vpack.c.bf16 %v2414_v16, %v2409_v14  ;;  %v2047_v20 = vpack.c.bf16 %v2418_v18, %v2416_v17  ;;  %v2424_v21 = vld [vmem:[%s444_s19 + $0x30] sm:$0xff]  ;;  %v2426_v22 = vld [vmem:[%s444_s19 + $0x38] sm:$0xff]  ;;  %v450_v23 = vld [vmem:[%s2400_s25] sm:$0xff]  ;;  %s1487_s21 = sshll.u32 %s427_s14, 4  ;;  %s1475_s19 = scalar_lea.sflag [#allocation7], %s426_s15  ;;  %s2729_s21 = int_to_ptr.vmem [resolvable:$true] %s1487_s21 }
  0x1f   : > { %v2050_v25 = vpack.c.bf16 %v2426_v22, %v2424_v21  ;;  %484 = vperm.xlu0 %2112, %v450_v23   ;;  %v452_v26 = vld [vmem:[%s2400_s25 + $0x10] sm:$0xff]  ;;  %v451_v29 = vld [vmem:[%s2400_s25 + $0x8] sm:$0xff]  ;;  %v453_v30 = vld [vmem:[%s2400_s25 + $0x18] sm:$0xff]  ;;  %s2166_s24 = scalar_lea.vmem %s2729_s21, 16  ;;  %s2170_s26 = sshll.u32 %s2251_s20, 4  ;;  %s2171_s26 = int_to_ptr.vmem [resolvable:$false] %s2170_s26 }
  0x20   : > { %494 = vperm.xlu1 %2113, %v452_v26   ;;  %v454_v34 = vld [vmem:[%s2400_s25 + $0x20] sm:$0xff]  ;;  %v455_v35 = vld [vmem:[%s2400_s25 + $0x28] sm:$0xff]  ;;  %1927 = vmatpush3.bf16.msra.mxu0 %v1924_v24  ;;  %v456_v39 = vld [vmem:[%s2400_s25 + $0x30] sm:$0xff]  ;;  %p2167_p12 = scmp.ne.s32.totalorder %s2729_s21, %s2166_s24  ;;  %p2173_p1 = scmp.lt.s32.totalorder %s2729_s21, %s2171_s26 }
  0x21   : > { %1929 = vmatprep.subr.bf16.mxu0 %v1928_v31  ;;  %v457_v40 = vld [vmem:[%s2400_s25 + $0x38] sm:$0xff]  ;;  %v458_v44 = vld [vmem:[%s2400_s25 + $0x40] sm:$0xff]  ;;  %v459_v45 = vld [vmem:[%s2400_s25 + $0x48] sm:$0xff] }
  0x22   : > { %v460_v47 = vld [vmem:[%s2400_s25 + $0x50] sm:$0xff]  ;;  %v461_v48 = vld [vmem:[%s2400_s25 + $0x58] sm:$0xff]  ;;  %v462_v49 = vld [vmem:[%s2400_s25 + $0x60] sm:$0xff]  ;;  %p2168_p13 = pnand %p2167_p12, %p2352_p4 }
  0x23   : > { %489 = vperm.xlu0 %2112, %v451_v29   ;;  %v463_v50 = vld [vmem:[%s2400_s25 + $0x68] sm:$0xff]  ;;  %v464_v51 = vld [vmem:[%s2400_s25 + $0x70] sm:$0xff]  ;;  %v465_v52 = vld [vmem:[%s2400_s25 + $0x78] sm:$0xff] }
  0x24   : > { %499 = vperm.xlu1 %2113, %v453_v30   ;;  %1931 = vmatpush3.bf16.msra.mxu0 %v1928_v31  ;;  %v581_v23 = vld [vmem:[%s2780_s6 + $0x18] sm:$0xff]  ;;  %v471_v30 = vld [vmem:[%s2779_s5 + $0x28] sm:$0xff]  ;;  %p2169_p0 = pneg %p2168_p13 }
  0x25   : > { %1933 = vmatprep.subr.bf16.mxu0 %v1932_v36  ;;  %v477_v0 = vld [vmem:[%s2779_s5 + $0x58] sm:$0xff] }
  0x27   : > { %504 = vperm.xlu0 %2112, %v454_v34  }
  0x28   : > { %509 = vperm.xlu1 %2113, %v455_v35   ;;  %1935 = vmatpush3.bf16.msra.mxu0 %v1932_v36  ;;  %v583_v35 = vld [vmem:[%s2780_s6 + $0x28] sm:$0xff] }
  0x29   : > { %1937 = vmatprep.subr.bf16.mxu0 %v1936_v41 }
  0x2b   : > { %514 = vperm.xlu0 %2112, %v456_v39  }
  0x2c   : > { %519 = vperm.xlu1 %2113, %v457_v40   ;;  %1939 = vmatpush3.bf16.msra.mxu0 %v1936_v41  ;;  %v472_v40 = vld [vmem:[%s2779_s5 + $0x30] sm:$0xff] }
  0x2d   : > { %1941 = vmatprep.subr.bf16.mxu0 %v1940_v46 }
  0x2f   : > { %524 = vperm.xlu0 %2112, %v458_v44   ;;  %v584_v44 = vld [vmem:[%s2780_s6 + $0x30] sm:$0xff] }
  0x30   : > { %529 = vperm.xlu1 %2113, %v459_v45   ;;  %1943 = vmatpush3.bf16.msra.mxu0 %v1940_v46  ;;  %v585_v46 = vld [vmem:[%s2780_s6 + $0x38] sm:$0xff] }
  0x31   : > { %1977 = vmatprep.subr.bf16.mxu0 %v1976_v59 }
  0x33   : > { %534 = vperm.xlu0 %2112, %v460_v47   ;;  %1750 = vmatmul.mubr.f32.vlgmr.msra.gmra.mrb[0].mxu0 %v2407_v13 }
  0x34   : > { %539 = vperm.xlu1 %2113, %v461_v48   ;;  %1752 = vmatprep.mubr.f32.mxu0 %v2409_v14 }
  0x35   : > { %1979 = vmatpush3.bf16.msra.mxu0 %v1976_v59 }
  0x36   : > { %1981 = vmatprep.subr.bf16.mxu0 %v1980_v63 }
  0x37   : > { %544 = vperm.xlu0 %2112, %v462_v49   ;;  %1753 = vmatmul.mubr.f32.gmra.mrb[2].mxu0 %v2414_v16 }
  0x38   : > { %549 = vperm.xlu1 %2113, %v463_v50   ;;  %1755 = vmatprep.mubr.f32.mxu0 %v2416_v17 }
  0x39   : > { %1983 = vmatpush3.bf16.msra.mxu0 %v1980_v63 }
  0x3a   : > { %1985 = vmatprep.subr.bf16.mxu0 %v1984_v9 }
  0x3b   : > { %554 = vperm.xlu0 %2112, %v464_v51   ;;  %1756 = vmatmul.mubr.f32.gmra.mrb[4].mxu0 %v2418_v18  ;;  %v474_v51 = vld [vmem:[%s2779_s5 + $0x40] sm:$0xff] }
  0x3c   : > { %559 = vperm.xlu1 %2113, %v465_v52   ;;  %1758 = vmatprep.mubr.f32.mxu0 %v2424_v21 }
  0x3d   : > { %1987 = vmatpush3.bf16.msra.mxu0 %v1984_v9  ;;  %v478_v9 = vld [vmem:[%s2779_s5 + $0x60] sm:$0xff] }
  0x3f   : > { %1759 = vmatmul.mubr.f32.gmra.mrb[6].mxu0 %v2426_v22 }
  0x9e   : > { %v485_v58 = vpop.permute.xlu0 %484 }
  0x9f   : > { %v562_v61 = vmul.f32 %v485_v58, %v466_v53  ;;  %v495_v62 = vpop.permute.xlu1 %494  ;;  %v475_v53 = vld [vmem:[%s2779_s5 + $0x48] sm:$0xff] }
  0xa0   : > { %v564_v3 = vmul.f32 %v495_v62, %v468_v54  ;;  %v476_v62 = vld [vmem:[%s2779_s5 + $0x50] sm:$0xff] }
  0xa1   : > { %v594_v10 = vadd.f32 %v578_v2, %v562_v61  ;;  %v588_v2 = vld [vmem:[%s2780_s6 + $0x50] sm:$0xff] }
  0xa2   : > { %v490_v8 = vpop.permute.xlu0 %489  ;;  %v596_v26 = vadd.f32 %v580_v5, %v564_v3 }
  0xa3   : > { %v563_v11 = vmul.f32 %v490_v8, %v467_v4  ;;  %v500_v24 = vpop.permute.xlu1 %499  ;;  %v589_v4 = vld [vmem:[%s2780_s6 + $0x58] sm:$0xff] }
  0xa4   : > { %v565_v27 = vmul.f32 %v500_v24, %v469_v6  ;;  %v590_v24 = vld [vmem:[%s2780_s6 + $0x60] sm:$0xff] }
  0xa5   : > { %v595_v29 = vadd.f32 %v579_v7, %v563_v11  ;;  %v479_v11 = vld [vmem:[%s2779_s5 + $0x68] sm:$0xff] }
  0xa6   : > { %v597_v31 = vadd.f32 %v581_v23, %v565_v27  ;;  %v505_v33 = vpop.permute.xlu0 %504  ;;  %v591_v27 = vld [vmem:[%s2780_s6 + $0x68] sm:$0xff] }
  0xa7   : > { %v1944_v34 = vpack.c.bf16 %v595_v29, %v594_v10  ;;  %v510_v36 = vpop.permute.xlu1 %509  ;;  %v566_v37 = vmul.f32 %v505_v33, %v470_v28 }
  0xa8   : > { %v567_v38 = vmul.f32 %v510_v36, %v471_v30  ;;  %v1948_v39 = vpack.c.bf16 %v597_v31, %v596_v26  ;;  %v592_v36 = vld [vmem:[%s2780_s6 + $0x70] sm:$0xff] }
  0xa9   : > { %1945 = vmatprep.subr.bf16.mxu1 %v1944_v34  ;;  %v598_v41 = vadd.f32 %v582_v32, %v566_v37  ;;  %v480_v32 = vld [vmem:[%s2779_s5 + $0x70] sm:$0xff] }
  0xaa   : > { %v599_v43 = vadd.f32 %v583_v35, %v567_v38  ;;  %1947 = vmatpush3.bf16.msra.mxu1 %v1944_v34  ;;  %v515_v45 = vpop.permute.xlu0 %514  ;;  %v481_v34 = vld [vmem:[%s2779_s5 + $0x78] sm:$0xff] }
  0xab   : > { %1949 = vmatprep.subr.bf16.mxu1 %v1948_v39  ;;  %v520_v47 = vpop.permute.xlu1 %519  ;;  %v568_v48 = vmul.f32 %v515_v45, %v472_v40  ;;  %v593_v38 = vld [vmem:[%s2780_s6 + $0x78] sm:$0xff] }
  0xac   : > { %v569_v49 = vmul.f32 %v520_v47, %v473_v42  ;;  %v1952_v50 = vpack.c.bf16 %v599_v43, %v598_v41 }
  0xad   : > { %v600_v52 = vadd.f32 %v584_v44, %v568_v48 }
  0xae   : > { %v601_v54 = vadd.f32 %v585_v46, %v569_v49  ;;  %1951 = vmatpush3.bf16.msra.mxu1 %v1948_v39  ;;  %v525_v56 = vpop.permute.xlu0 %524  ;;  %v1586_v46 = vld [vmem:[%s2778_s4] ss:$0 sm:$0xff] }
  0xaf   : > { %1953 = vmatprep.subr.bf16.mxu1 %v1952_v50  ;;  %v530_v58 = vpop.permute.xlu1 %529  ;;  %v570_v59 = vmul.f32 %v525_v56, %v474_v51 }
  0xb0   : > { %v571_v60 = vmul.f32 %v530_v58, %v475_v53  ;;  %v1956_v61 = vpack.c.bf16 %v601_v54, %v600_v52 }
  0xb1   : > { %v602_v63 = vadd.f32 %v586_v55, %v570_v59 }
  0xb2   : > { %v603_v1 = vadd.f32 %v587_v57, %v571_v60  ;;  %1955 = vmatpush3.bf16.msra.mxu1 %v1952_v50  ;;  %v535_v3 = vpop.permute.xlu0 %534 }
  0xb3   : > { %1957 = vmatprep.subr.bf16.mxu1 %v1956_v61  ;;  %v540_v5 = vpop.permute.xlu1 %539  ;;  %v572_v6 = vmul.f32 %v535_v3, %v476_v62  ;;  %v951_v3 = vld [vmem:[%s2782_s8 + $0x48] sm:$0xff] }
  0xb4   : > { %v573_v7 = vmul.f32 %v540_v5, %v477_v0  ;;  %v1960_v8 = vpack.c.bf16 %v603_v1, %v602_v63  ;;  %v948_v63 = vld [vmem:[%s2782_s8 + $0x30] sm:$0xff]  ;;  %v949_v0 = vld [vmem:[%s2782_s8 + $0x38] sm:$0xff] }
  0xb5   : > { %v604_v10 = vadd.f32 %v588_v2, %v572_v6  ;;  %v1988_v1 = vpack.c.bf16 %v949_v0, %v948_v63  ;;  %v950_v2 = vld [vmem:[%s2782_s8 + $0x40] sm:$0xff]  ;;  %v952_v5 = vld [vmem:[%s2782_s8 + $0x50] sm:$0xff]  ;;  %v953_v6 = vld [vmem:[%s2782_s8 + $0x58] sm:$0xff] }
  0xb6   : > { %v605_v23 = vadd.f32 %v589_v4, %v573_v7  ;;  %1959 = vmatpush3.bf16.msra.mxu1 %v1956_v61  ;;  %v545_v26 = vpop.permute.xlu0 %544  ;;  %v1992_v4 = vpack.c.bf16 %v951_v3, %v950_v2  ;;  %v1996_v7 = vpack.c.bf16 %v953_v6, %v952_v5 }
  0xb7   : > { %1961 = vmatprep.subr.bf16.mxu1 %v1960_v8  ;;  %v550_v28 = vpop.permute.xlu1 %549  ;;  %v574_v29 = vmul.f32 %v545_v26, %v478_v9  ;;  %1989 = vmatprep.subr.bf16.mxu0 %v1988_v1  ;;  %v955_v9 = vld [vmem:[%s2782_s8 + $0x68] sm:$0xff]  ;;  %v1133_v26 = vld [vmem:[%s2784_s10] sm:$0xff] }
  0xb8   : > { %v575_v30 = vmul.f32 %v550_v28, %v479_v11  ;;  %v1964_v31 = vpack.c.bf16 %v605_v23, %v604_v10  ;;  %1991 = vmatpush3.bf16.msra.mxu0 %v1988_v1  ;;  %v956_v11 = vld [vmem:[%s2782_s8 + $0x70] sm:$0xff]  ;;  %v957_v23 = vld [vmem:[%s2782_s8 + $0x78] sm:$0xff] }
  0xb9   : > { %v606_v33 = vadd.f32 %v590_v24, %v574_v29  ;;  %1993 = vmatprep.subr.bf16.mxu0 %v1992_v4  ;;  %v2004_v24 = vpack.c.bf16 %v957_v23, %v956_v11  ;;  %v1135_v28 = vld [vmem:[%s2784_s10 + $0x10] sm:$0xff] }
  0xba   : > { %v607_v35 = vadd.f32 %v591_v27, %v575_v30  ;;  %1963 = vmatpush3.bf16.msra.mxu1 %v1960_v8  ;;  %v555_v37 = vpop.permute.xlu0 %554  ;;  %v954_v8 = vld [vmem:[%s2782_s8 + $0x60] sm:$0xff]  ;;  %v1134_v27 = vld [vmem:[%s2784_s10 + $0x8] sm:$0xff]  ;;  %v1136_v30 = vld [vmem:[%s2784_s10 + $0x18] sm:$0xff] }
  0xbb   : > { %1965 = vmatprep.subr.bf16.mxu1 %v1964_v31  ;;  %v560_v39 = vpop.permute.xlu1 %559  ;;  %v576_v40 = vmul.f32 %v555_v37, %v480_v32  ;;  %v2000_v10 = vpack.c.bf16 %v955_v9, %v954_v8  ;;  %v2008_v29 = vpack.c.bf16 %v1134_v27, %v1133_v26  ;;  %v1587_v32 = vld [vmem:[%s2781_s7] ss:$0 sm:$0xff] }
  0xbc   : > { %v577_v41 = vmul.f32 %v560_v39, %v481_v34  ;;  %v1968_v42 = vpack.c.bf16 %v607_v35, %v606_v33  ;;  %1995 = vmatpush3.bf16.msra.mxu0 %v1992_v4 }
  0xbd   : > { %v608_v43 = vadd.f32 %v592_v36, %v576_v40  ;;  %1997 = vmatprep.subr.bf16.mxu0 %v1996_v7 }
  0xbe   : > { %v609_v44 = vadd.f32 %v593_v38, %v577_v41  ;;  %1967 = vmatpush3.bf16.msra.mxu1 %v1964_v31  ;;  %v2012_v31 = vpack.c.bf16 %v1136_v30, %v1135_v28 }
  0xbf   : > { %1969 = vmatprep.subr.bf16.mxu1 %v1968_v42 }
  0xc0   : > { %v1972_v45 = vpack.c.bf16 %v609_v44, %v608_v43  ;;  %1999 = vmatpush3.bf16.msra.mxu0 %v1996_v7 }
  0xc1   : > { %2001 = vmatprep.subr.bf16.mxu0 %v2000_v10 }
  0xc2   : > { %1971 = vmatpush3.bf16.msra.mxu1 %v1968_v42 }
  0xc3   : > { %1973 = vmatprep.subr.bf16.mxu1 %v1972_v45 }
  0xc4   : > { %2003 = vmatpush3.bf16.msra.mxu0 %v2000_v10 }
  0xc5   : > { %2005 = vmatprep.subr.bf16.mxu0 %v2004_v24 }
  0xc6   : > { %1975 = vmatpush3.bf16.msra.mxu1 %v1972_v45 }
  0xc7   : > { %2009 = vmatprep.subr.bf16.mxu1 %v2008_v29 }
  0xc8   : > { %2007 = vmatpush3.bf16.msra.mxu0 %v2004_v24 }
 0x106   : > { %v1751_v47 = vpop.f32.mrb[0].mxu0 }
 0x107   : > { %v727_v48 = vpop.f32.mrb[1].mxu0  ;;  %v733_v50 = vadd.f32 %v1751_v47, %v1586_v46 }
 0x108   : > { %v728_v49 = vadd.f32 %v1586_v46, %v727_v48 }
 0x10a   : > { %v1754_v51 = vpop.f32.mrb[2].mxu0  ;;  %1793 = vmatprep.mubr.f32.mxu1 %v728_v49 }
 0x10b   : > { %v737_v52 = vpop.f32.mrb[3].mxu0  ;;  %1794 = vmatmul.mubr.f32.vlgmr.msra.gmra.mrb[0].mxu1 %v733_v50  ;;  %v743_v54 = vadd.f32 %v1754_v51, %v1586_v46 }
 0x10c   : > { %v738_v53 = vadd.f32 %v1586_v46, %v737_v52  ;;  %2011 = vmatpush3.bf16.msra.mxu1 %v2008_v29 }
 0x10d   : > { %2013 = vmatprep.subr.bf16.mxu1 %v2012_v31 }
 0x10e   : > { %v1757_v55 = vpop.f32.mrb[4].mxu0  ;;  %1796 = vmatprep.mubr.f32.mxu1 %v738_v53 }
 0x10f   : > { %v747_v56 = vpop.f32.mrb[5].mxu0  ;;  %1797 = vmatmul.mubr.f32.gmra.mrb[2].mxu1 %v743_v54  ;;  %v753_v58 = vadd.f32 %v1757_v55, %v1586_v46 }
 0x110   : > { %v748_v57 = vadd.f32 %v1586_v46, %v747_v56  ;;  %2015 = vmatpush3.bf16.msra.mxu1 %v2012_v31 }
 0x112   : > { %v1760_v59 = vpop.f32.mrb[6].mxu0  ;;  %1799 = vmatprep.mubr.f32.mxu1 %v748_v57 }
 0x113   : > { %v757_v60 = vpop.f32.mrb[7].mxu0  ;;  %1800 = vmatmul.mubr.f32.gmra.mrb[4].mxu1 %v753_v58  ;;  %v763_v62 = vadd.f32 %v1760_v59, %v1586_v46 }
 0x114   : > { %v758_v61 = vadd.f32 %v1586_v46, %v757_v60 }
 0x116   : > { %1802 = vmatprep.mubr.f32.mxu1 %v758_v61 }
 0x117   : > { %1803 = vmatmul.mubr.f32.gmra.mrb[6].mxu1 %v763_v62 }
 0x1de   : > { %v1795_v33 = vpop.f32.mrb[0].mxu1 }
 0x1df   : > { %v861_v34 = vadd.f32 %v1795_v33, %v1587_v32  ;;  %v855_v35 = vpop.f32.mrb[1].mxu1 }
 0x1e0   : > { %v856_v36 = vadd.f32 %v1587_v32, %v855_v35 }
 0x1e1   : > { %v903_v37 = vmin.f32 %v861_v34, 0.0  ;;  %vm895_vm1 = vcmp.gt.f32.partialorder %v861_v34, 0.0 }
 0x1e2   : > { %v902_v38 = vmin.f32 %v856_v36, 0.0  ;;  %v1798_v39 = vpop.f32.mrb[2].mxu1  ;;  %vm894_vm0 = vcmp.gt.f32.partialorder %v856_v36, 0.0 }
 0x1e3   : > { %v912_v40 = vmul.f32 1.442695, %v903_v37  ;;  %v871_v41 = vadd.f32 %v1798_v39, %v1587_v32  ;;  %v865_v42 = vpop.f32.mrb[3].mxu1  ;;  %v1137_v37 = vld [vmem:[%s2784_s10 + $0x20] sm:$0xff] }
 0x1e4   : > { %v910_v43 = vmul.f32 1.442695, %v902_v38  ;;  %v866_v44 = vadd.f32 %v1587_v32, %v865_v42  ;;  %v1138_v38 = vld [vmem:[%s2784_s10 + $0x28] sm:$0xff] }
 0x1e5   : > { %2114 = vpow2.f32 %v912_v40  ;;  %v905_v45 = vmin.f32 %v871_v41, 0.0  ;;  %vm897_vm3 = vcmp.gt.f32.partialorder %v871_v41, 0.0  ;;  %v2016_v39 = vpack.c.bf16 %v1138_v38, %v1137_v37  ;;  %v1139_v40 = vld [vmem:[%s2784_s10 + $0x30] sm:$0xff] }
 0x1e6   : > { %2116 = vpow2.f32 %v910_v43  ;;  %v904_v46 = vmin.f32 %v866_v44, 0.0  ;;  %v1801_v47 = vpop.f32.mrb[4].mxu1  ;;  %vm896_vm2 = vcmp.gt.f32.partialorder %v866_v44, 0.0  ;;  %v1141_v43 = vld [vmem:[%s2784_s10 + $0x40] sm:$0xff] }
 0x1e7   : > { %v916_v48 = vmul.f32 1.442695, %v905_v45  ;;  %v881_v49 = vadd.f32 %v1801_v47, %v1587_v32  ;;  %v875_v50 = vpop.f32.mrb[5].mxu1  ;;  %2017 = vmatprep.subr.bf16.mxu1 %v2016_v39  ;;  %v1144_v47 = vld [vmem:[%s2784_s10 + $0x58] sm:$0xff] }
 0x1e8   : > { %v914_v51 = vmul.f32 1.442695, %v904_v46  ;;  %v876_v52 = vadd.f32 %v1587_v32, %v875_v50  ;;  %2019 = vmatpush3.bf16.msra.mxu1 %v2016_v39  ;;  %v1143_v46 = vld [vmem:[%s2784_s10 + $0x50] sm:$0xff]  ;;  %v1146_v50 = vld [vmem:[%s2784_s10 + $0x68] sm:$0xff] }
 0x1e9   : > { %2118 = vpow2.f32 %v916_v48  ;;  %v907_v53 = vmin.f32 %v881_v49, 0.0  ;;  %vm899_vm5 = vcmp.gt.f32.partialorder %v881_v49, 0.0  ;;  %v2028_v48 = vpack.c.bf16 %v1144_v47, %v1143_v46 }
 0x1ea   : > { %2120 = vpow2.f32 %v914_v51  ;;  %v906_v54 = vmin.f32 %v876_v52, 0.0  ;;  %v1804_v55 = vpop.f32.mrb[6].mxu1  ;;  %vm898_vm4 = vcmp.gt.f32.partialorder %v876_v52, 0.0 }
 0x1eb   : > { %v920_v56 = vmul.f32 1.442695, %v907_v53  ;;  %v891_v57 = vadd.f32 %v1804_v55, %v1587_v32  ;;  %v885_v58 = vpop.f32.mrb[7].mxu1  ;;  %v1148_v53 = vld [vmem:[%s2784_s10 + $0x78] sm:$0xff]  ;;  %v1596_v55 = vld [vmem:[%s2783_s9] ss:$0 sm:$0xff] }
 0x1ec   : > { %v918_v59 = vmul.f32 1.442695, %v906_v54  ;;  %v886_v60 = vadd.f32 %v1587_v32, %v885_v58 }
 0x1ed   : > { %2122 = vpow2.f32 %v920_v56  ;;  %v909_v61 = vmin.f32 %v891_v57, 0.0  ;;  %vm901_vm7 = vcmp.gt.f32.partialorder %v891_v57, 0.0 }
 0x1ee   : > { %2124 = vpow2.f32 %v918_v59  ;;  %v908_v62 = vmin.f32 %v886_v60, 0.0  ;;  %vm900_vm6 = vcmp.gt.f32.partialorder %v886_v60, 0.0 }
 0x1ef   : > { %v2115_v63 = vpop.eup %2114  ;;  %v924_v0 = vmul.f32 1.442695, %v909_v61 }
 0x1f0   : > { %v2117_v1 = vpop.eup %2116  ;;  %v1589_v2 = vadd.f32 -1.0, %v2115_v63  ;;  %v922_v3 = vmul.f32 1.442695, %v908_v62 }
 0x1f1   : > { %2126 = vpow2.f32 %v924_v0  ;;  %v1588_v4 = vadd.f32 -1.0, %v2117_v1 }
 0x1f2   : > { %2128 = vpow2.f32 %v922_v3  ;;  %v935_v8 = vsel %vm895_vm1, %v861_v34, %v1589_v2  ;;  %vm1255_vm1 = vcmask 7168  }
 0x1f3   : > { %v2119_v5 = vpop.eup %2118  ;;  %v934_v6 = vsel %vm894_vm0, %v856_v36, %v1588_v4  ;;  %vm626_vm0 = vcmask 0  }
 0x1f4   : > { %v2121_v7 = vpop.eup %2120  ;;  %1837 = vmatprep.mubr.f32.mxu0 %v934_v6  ;;  %v1591_v9 = vadd.f32 -1.0, %v2119_v5 }
 0x1f5   : > { %1838 = vmatmul.mubr.f32.vlgmr.msra.gmra.mrb[8].mxu0 %v935_v8  ;;  %v1590_v10 = vadd.f32 -1.0, %v2121_v7 }
 0x1f6   : > { %v937_v26 = vsel %vm897_vm3, %v871_v41, %v1591_v9  ;;  %v1140_v41 = vld [vmem:[%s2784_s10 + $0x38] sm:$0xff]  ;;  %vm1369_vm3 = vcmask 523264  }
 0x1f7   : > { %v2123_v11 = vpop.eup %2122  ;;  %v936_v23 = vsel %vm896_vm2, %v866_v44, %v1590_v10  ;;  %v2020_v42 = vpack.c.bf16 %v1140_v41, %v1139_v40  ;;  %v1142_v44 = vld [vmem:[%s2784_s10 + $0x48] sm:$0xff]  ;;  %vm2250_vm2 = vmmov 0  }
 0x1f8   : > { %v2125_v24 = vpop.eup %2124  ;;  %1840 = vmatprep.mubr.f32.mxu0 %v936_v23  ;;  %v1593_v27 = vadd.f32 -1.0, %v2123_v11  ;;  %v2024_v45 = vpack.c.bf16 %v1142_v44, %v1141_v43 }
 0x1f9   : > { %1841 = vmatmul.mubr.f32.gmra.mrb[10].mxu0 %v937_v26  ;;  %v1592_v28 = vadd.f32 -1.0, %v2125_v24  ;;  %2021 = vmatprep.subr.bf16.mxu1 %v2020_v42 }
 0x1fa   : > { %v939_v32 = vsel %vm899_vm5, %v881_v49, %v1593_v27  ;;  %2023 = vmatpush3.bf16.msra.mxu1 %v2020_v42  ;;  %v1145_v49 = vld [vmem:[%s2784_s10 + $0x60] sm:$0xff] }
 0x1fb   : > { %v2127_v29 = vpop.eup %2126  ;;  %v938_v30 = vsel %vm898_vm4, %v876_v52, %v1592_v28  ;;  %2025 = vmatprep.subr.bf16.mxu1 %v2024_v45  ;;  %v2032_v51 = vpack.c.bf16 %v1146_v50, %v1145_v49  ;;  %v1147_v52 = vld [vmem:[%s2784_s10 + $0x70] sm:$0xff] }
 0x1fc   : > { %v2129_v31 = vpop.eup %2128  ;;  %1843 = vmatprep.mubr.f32.mxu0 %v938_v30  ;;  %v1595_v33 = vadd.f32 -1.0, %v2127_v29  ;;  %v2036_v54 = vpack.c.bf16 %v1148_v53, %v1147_v52 }
 0x1fd   : > { %1844 = vmatmul.mubr.f32.gmra.mrb[12].mxu0 %v939_v32  ;;  %v1594_v34 = vadd.f32 -1.0, %v2129_v31 }
 0x1fe   : > { %v941_v36 = vsel %vm901_vm7, %v891_v57, %v1595_v33  ;;  %2027 = vmatpush3.bf16.msra.mxu1 %v2024_v45  ;;  %v1597_v57 = vld [vmem:[%s435_s28] ss:$0 sm:$0xff]  ;;  %s2172_s28 = scalar_lea.vmem %s2171_s26, 32 }
 0x1ff   : > { %v940_v35 = vsel %vm900_vm6, %v886_v60, %v1594_v34  ;;  %2029 = vmatprep.subr.bf16.mxu1 %v2028_v48  ;;  %p2174_p2 = scmp.lt.s32.totalorder %s2172_s28, %s2166_s24 }
 0x200   : > { %1846 = vmatprep.mubr.f32.mxu0 %v940_v35 }
 0x201   : > { %1847 = vmatmul.mubr.f32.gmra.mrb[14].mxu0 %v941_v36  ;;  %p2175_p3 = por %p2174_p2, %p2173_p1 }
 0x202   : > { %2031 = vmatpush3.bf16.msra.mxu1 %v2028_v48 }
 0x203   : > { %2033 = vmatprep.subr.bf16.mxu1 %v2032_v51  ;;  %p2176_p5 = pnand %p2175_p3, %p2169_p0 }
 0x206   : > { %2035 = vmatpush3.bf16.msra.mxu1 %v2032_v51 }
 0x207   : > { %2037 = vmatprep.subr.bf16.mxu1 %v2036_v54 }
 0x20a   : > { %2039 = vmatpush3.bf16.msra.mxu1 %v2036_v54 }
 0x2c8   : > { %v1839_v56 = vpop.f32.mrb[8].mxu0 }
 0x2c9   : > { %v1037_v58 = vadd.f32 %v1839_v56, %v1596_v55  ;;  %v1031_v59 = vpop.f32.mrb[9].mxu0 }
 0x2ca   : > { %v1032_v60 = vadd.f32 %v1596_v55, %v1031_v59 }
 0x2cb   : > { %v1078_v61 = vmul.f32 %v1597_v57, %v1037_v58 }
 0x2cc   : > { %v1077_v62 = vmul.f32 %v1597_v57, %v1032_v60  ;;  %v1842_v63 = vpop.f32.mrb[10].mxu0 }
 0x2cd   : > { %v1094_v0 = vmin.f32 %v1078_v61, 0.0  ;;  %v1047_v1 = vadd.f32 %v1842_v63, %v1596_v55  ;;  %v1041_v2 = vpop.f32.mrb[11].mxu0  ;;  %vm1086_vm9 = vcmp.gt.f32.partialorder %v1078_v61, 0.0 }
 0x2ce   : > { %v1093_v3 = vmin.f32 %v1077_v62, 0.0  ;;  %v1042_v4 = vadd.f32 %v1596_v55, %v1041_v2  ;;  %vm1085_vm8 = vcmp.gt.f32.partialorder %v1077_v62, 0.0 }
 0x2cf   : > { %v1103_v5 = vmul.f32 1.442695, %v1094_v0  ;;  %v1080_v6 = vmul.f32 %v1597_v57, %v1047_v1 }
 0x2d0   : > { %v1101_v7 = vmul.f32 1.442695, %v1093_v3  ;;  %v1079_v8 = vmul.f32 %v1597_v57, %v1042_v4  ;;  %v1845_v9 = vpop.f32.mrb[12].mxu0 }
 0x2d1   : > { %2130 = vpow2.f32 %v1103_v5  ;;  %v1096_v10 = vmin.f32 %v1080_v6, 0.0  ;;  %v1057_v11 = vadd.f32 %v1845_v9, %v1596_v55  ;;  %v1051_v23 = vpop.f32.mrb[13].mxu0  ;;  %vm1088_vm11 = vcmp.gt.f32.partialorder %v1080_v6, 0.0 }
 0x2d2   : > { %2132 = vpow2.f32 %v1101_v7  ;;  %v1095_v24 = vmin.f32 %v1079_v8, 0.0  ;;  %v1052_v26 = vadd.f32 %v1596_v55, %v1051_v23  ;;  %vm1087_vm10 = vcmp.gt.f32.partialorder %v1079_v8, 0.0 }
 0x2d3   : > { %v1107_v27 = vmul.f32 1.442695, %v1096_v10  ;;  %v1082_v28 = vmul.f32 %v1597_v57, %v1057_v11  ;;  %v2247_v5 = vmov -inf   ;;  %v2249_v7 = vmov 0.0|0.0  }
 0x2d4   : > { %v1105_v29 = vmul.f32 1.442695, %v1095_v24  ;;  %v1081_v30 = vmul.f32 %v1597_v57, %v1052_v26  ;;  %v1848_v31 = vpop.f32.mrb[14].mxu0  ;;  %627 = vst.msk [vmem:[#allocation3] sm:$0x1] %vm626_vm0, %v2247_v5  ;;  %2040 = vmatprep.subr.bf16.mxu0 %v2249_v7 }
 0x2d5   : > { %2134 = vpow2.f32 %v1107_v27  ;;  %v1098_v32 = vmin.f32 %v1082_v28, 0.0  ;;  %v1067_v33 = vadd.f32 %v1848_v31, %v1596_v55  ;;  %v1061_v34 = vpop.f32.mrb[15].mxu0  ;;  %vm1090_vm13 = vcmp.gt.f32.partialorder %v1082_v28, 0.0  ;;  %2042 = vmatpush3.bf16.msra.mxu0 %v2041_v15 }
 0x2d6   : > { %2136 = vpow2.f32 %v1105_v29  ;;  %v1097_v35 = vmin.f32 %v1081_v30, 0.0  ;;  %v1062_v36 = vadd.f32 %v1596_v55, %v1061_v34  ;;  %vm1089_vm12 = vcmp.gt.f32.partialorder %v1081_v30, 0.0  ;;  %2043 = vmatprep.subr.bf16.mxu0 %v2249_v7 }
 0x2d7   : > { %v1111_v37 = vmul.f32 1.442695, %v1098_v32  ;;  %v1084_v38 = vmul.f32 %v1597_v57, %v1067_v33  ;;  %v1282_v33 = vlaneseq }
 0x2d8   : > { %v1109_v39 = vmul.f32 1.442695, %v1097_v35  ;;  %v1083_v40 = vmul.f32 %v1597_v57, %v1062_v36 }
 0x2d9   : > { %2138 = vpow2.f32 %v1111_v37  ;;  %v1100_v41 = vmin.f32 %v1084_v38, 0.0  ;;  %vm1092_vm15 = vcmp.gt.f32.partialorder %v1084_v38, 0.0  ;;  %2045 = vmatpush3.bf16.msra.mxu0 %v2044_v19  ;;  %v1283_v36 = vshrl.u32 %v1282_v33, 7 }
 0x2da   : > { %2140 = vpow2.f32 %v1109_v39  ;;  %v1099_v42 = vmin.f32 %v1083_v40, 0.0  ;;  %vm1091_vm14 = vcmp.gt.f32.partialorder %v1083_v40, 0.0  ;;  %2046 = vmatprep.subr.bf16.mxu0 %v2249_v7 }
 0x2db   : > { %v2131_v43 = vpop.eup %2130  ;;  %v1115_v44 = vmul.f32 1.442695, %v1100_v41 }
 0x2dc   : > { %v2133_v45 = vpop.eup %2132  ;;  %v1113_v46 = vmul.f32 1.442695, %v1099_v42  ;;  %v1599_v47 = vadd.f32 -1.0, %v2131_v43 }
 0x2dd   : > { %2142 = vpow2.f32 %v1115_v44  ;;  %v1598_v48 = vadd.f32 -1.0, %v2133_v45  ;;  %2048 = vmatpush3.bf16.msra.mxu0 %v2047_v20 }
 0x2de   : > { %2144 = vpow2.f32 %v1113_v46  ;;  %v1126_v52 = vsel %vm1086_vm9, %v1078_v61, %v1599_v47  ;;  %2049 = vmatprep.subr.bf16.mxu0 %v2249_v7 }
 0x2df   : > { %v2135_v49 = vpop.eup %2134  ;;  %v1125_v50 = vsel %vm1085_vm8, %v1077_v62, %v1598_v48 }
 0x2e0   : > { %v2137_v51 = vpop.eup %2136  ;;  %1881 = vmatprep.mubr.f32.mxu1 %v1125_v50  ;;  %v1601_v53 = vadd.f32 -1.0, %v2135_v49 }
 0x2e1   : > { %1882 = vmatmul.mubr.f32.vlgmr.msra.gmra.mrb[8].mxu1 %v1126_v52  ;;  %v1600_v54 = vadd.f32 -1.0, %v2137_v51  ;;  %2051 = vmatpush3.bf16.msra.mxu0 %v2050_v25 }
 0x2e2   : > { %v1128_v58 = vsel %vm1088_vm11, %v1080_v6, %v1601_v53  ;;  %v2248_v6 = vmov 0.0  }
 0x2e3   : > { %v2139_v55 = vpop.eup %2138  ;;  %v1127_v56 = vsel %vm1087_vm10, %v1079_v8, %v1600_v54  ;;  %628 = vst.msk [vmem:[#allocation4] sm:$0x1] %vm626_vm0, %v2248_v6  ;;  %629 = vst [vmem:[#allocation5] sm:$0x1] %v2248_v6  ;;  %1909 = vmatprep.mubr.msk.f32.mxu0 %vm2250_vm2, %v2248_v6 }
 0x2e4   : > { %v2141_v57 = vpop.eup %2140  ;;  %1884 = vmatprep.mubr.f32.mxu1 %v1127_v56  ;;  %v1603_v59 = vadd.f32 -1.0, %v2139_v55 }
 0x2e5   : > { %1885 = vmatmul.mubr.f32.gmra.mrb[10].mxu1 %v1128_v58  ;;  %v1602_v60 = vadd.f32 -1.0, %v2141_v57 }
 0x2e6   : > { %v1130_v61 = vsel %vm1090_vm13, %v1082_v28, %v1603_v59 }
 0x2e7   : > { %v2143_v63 = vpop.eup %2142  ;;  %v1129_v0 = vsel %vm1089_vm12, %v1081_v30, %v1602_v60 }
 0x2e8   : > { %v2145_v62 = vpop.eup %2144  ;;  %1887 = vmatprep.mubr.f32.mxu1 %v1129_v0  ;;  %v1605_v1 = vadd.f32 -1.0, %v2143_v63 }
 0x2e9   : > { %1888 = vmatmul.mubr.f32.gmra.mrb[12].mxu1 %v1130_v61  ;;  %v1604_v2 = vadd.f32 -1.0, %v2145_v62 }
 0x2ea   : > { %v1132_v4 = vsel %vm1092_vm15, %v1084_v38, %v1605_v1  ;;  %v1254_v38 = vld [vmem:[#allocation3] sm:$0x1] }
 0x2eb   : > { %v1131_v3 = vsel %vm1091_vm14, %v1083_v40, %v1604_v2  ;;  %v2706_v40 = vsub.s32 0, %v1283_v36  ;;  %v1443_v36 = vld [vmem:[#allocation5] sm:$0x1] }
 0x2ec   : > { %1890 = vmatprep.mubr.f32.mxu1 %v1131_v3 }
 0x2ed   : > { %1891 = vmatmul.mubr.f32.gmra.mrb[14].mxu1 %v1132_v4 }
 0x3b4   : > { %v1883_v8 = vpop.f32.mrb[8].mxu1 }
 0x3b5   : > { %v1215_v9 = vpop.f32.mrb[9].mxu1  ;;  %v1257_v15 = vsel %vm1255_vm1, %v1883_v8, -inf }
 0x3b6   : > { %v1256_v19 = vsel %vm1255_vm1, %v1215_v9, -inf }
 0x3b8   : > { %v1886_v10 = vpop.f32.mrb[10].mxu1 }
 0x3b9   : > { %v1225_v12 = vpop.f32.mrb[11].mxu1  ;;  %v1259_v21 = vsel %vm1255_vm1, %v1886_v10, -inf }
 0x3ba   : > { %v1258_v24 = vsel %vm1255_vm1, %v1225_v12, -inf }
 0x3bc   : > { %v1889_v13 = vpop.f32.mrb[12].mxu1 }
 0x3bd   : > { %v1262_v14 = vsel %vm1255_vm1, %v1889_v13, -inf  ;;  %v1235_v16 = vpop.f32.mrb[13].mxu1 }
 0x3be   : > { %v1263_v17 = vmax.f32 %v1257_v15, %v1262_v14  ;;  %v1260_v18 = vsel %vm1255_vm1, %v1235_v16, -inf }
 0x3bf   : > { %v1261_v20 = vmax.f32 %v1256_v19, %v1260_v18 }
 0x3c0   : > { %v1892_v11 = vpop.f32.mrb[14].mxu1 }
 0x3c1   : > { %v1268_v22 = vmax.f32 %v1261_v20, %v1263_v17  ;;  %v1266_v25 = vsel %vm1255_vm1, %v1892_v11, -inf  ;;  %v1245_v23 = vpop.f32.mrb[15].mxu1 }
 0x3c2   : > { %v1267_v26 = vmax.f32 %v1259_v21, %v1266_v25  ;;  %v1264_v27 = vsel %vm1255_vm1, %v1245_v23, -inf }
 0x3c3   : > { %v1265_v28 = vmax.f32 %v1258_v24, %v1264_v27  ;;  %v1311_v24 = vld [vmem:[#allocation4] sm:$0x1] }
 0x3c5   : > { %v1269_v29 = vmax.f32 %v1265_v28, %v1267_v26 }
 0x3c7   : > { %v1270_v30 = vmax.f32 %v1268_v22, %v1269_v29 }
 0x3c9   : > { %v1271_v31 = vrot.slane %v1270_v30, 4 }
 0x3cb   : > { %v1272_v32 = vmax.f32 %v1270_v30, %v1271_v31 }
 0x3cd   : > { %v1273_v34 = vrot.slane %v1272_v32, 2 }
 0x3cf   : > { %v1274_v35 = vmax.f32 %v1272_v32, %v1273_v34 }
 0x3d1   : > { %v1275_v37 = vrot.slane %v1274_v35, 1 }
 0x3d3   : > { %v1276_v39 = vmax.f32 %v1274_v35, %v1275_v37 }
 0x3d5   : > { %v1277_v41 = vmax.f32 %v1254_v38, %v1276_v39 }
 0x3d7   : > { %v1278_v42 = vsub.f32 %v1254_v38, %v1277_v41  ;;  %v1285_v43 = vrot.slane %v1277_v41, %v2706_v40  ;;  %1456 = vst.msk [vmem:[#allocation3] sm:$0x1] %vm626_vm0, %v1277_v41 }
 0x3d9   : > { %v1279_v44 = vmul.f32 1.442695, %v1278_v42  ;;  %v1287_v45 = vsub.f32 %v1215_v9, %v1285_v43  ;;  %v1288_v46 = vsub.f32 %v1883_v8, %v1285_v43  ;;  %v1289_v47 = vsub.f32 %v1225_v12, %v1285_v43 }
 0x3da   : > { %v1290_v48 = vsub.f32 %v1886_v10, %v1285_v43  ;;  %v1291_v49 = vsub.f32 %v1235_v16, %v1285_v43  ;;  %v1292_v50 = vsub.f32 %v1889_v13, %v1285_v43  ;;  %v1293_v51 = vsub.f32 %v1245_v23, %v1285_v43 }
 0x3db   : > { %2146 = vpow2.f32 %v1279_v44  ;;  %v1294_v52 = vsub.f32 %v1892_v11, %v1285_v43  ;;  %v1295_v53 = vmul.f32 1.442695, %v1287_v45  ;;  %v1297_v54 = vmul.f32 1.442695, %v1288_v46 }
 0x3dc   : > { %v1299_v55 = vmul.f32 1.442695, %v1289_v47  ;;  %v1301_v56 = vmul.f32 1.442695, %v1290_v48  ;;  %v1303_v57 = vmul.f32 1.442695, %v1291_v49 }
 0x3dd   : > { %2148 = vpow2.f32 %v1295_v53  ;;  %v1305_v58 = vmul.f32 1.442695, %v1292_v50  ;;  %v1307_v59 = vmul.f32 1.442695, %v1293_v51  ;;  %v1309_v60 = vmul.f32 1.442695, %v1294_v52 }
 0x3de   : > { %2150 = vpow2.f32 %v1297_v54 }
 0x3df   : > { %2152 = vpow2.f32 %v1299_v55 }
 0x3e0   : > { %2154 = vpow2.f32 %v1301_v56 }
 0x3e1   : > { %2156 = vpow2.f32 %v1303_v57 }
 0x3e2   : > { %2158 = vpow2.f32 %v1305_v58 }
 0x3e3   : > { %2160 = vpow2.f32 %v1307_v59 }
 0x3e4   : > { %2162 = vpow2.f32 %v1309_v60 }
 0x3e5   : > { %v2147_v63 = vpop.eup %2146 }
 0x3e6   : > { %1446 = vperm.xlu1 %2113, %v2147_v63   ;;  %v1312_v27 = vmul.f32 %v2147_v63, %v1311_v24 }
 0x3e7   : > { %v2149_v0 = vpop.eup %2148 }
 0x3e8   : > { %v2151_v62 = vpop.eup %2150  ;;  %v1313_v61 = vsel %vm1255_vm1, %v2149_v0, 0.0  ;;  %1337 = vxpose.xlu0.b32.start [1/8] (short) (narrow) %v2149_v0, 8 }
 0x3e9   : > { %v2153_v1 = vpop.eup %2152  ;;  %v1314_v2 = vsel %vm1255_vm1, %v2151_v62, 0.0 }
 0x3ea   : > { %v2155_v3 = vpop.eup %2154  ;;  %v1315_v4 = vadd.f32 %v1314_v2, %v1313_v61  ;;  %v1316_v5 = vsel %vm1255_vm1, %v2153_v1, 0.0 }
 0x3eb   : > { %v2157_v7 = vpop.eup %2156  ;;  %v1318_v9 = vsel %vm1255_vm1, %v2155_v3, 0.0 }
 0x3ec   : > { %v1317_v8 = vadd.f32 %v1316_v5, %v1315_v4  ;;  %1338 = vxpose.xlu0.b32.cont [2/8] (short) (narrow) %v2151_v62, 8  ;;  %v2159_v10 = vpop.eup %2158  ;;  %v1320_v6 = vsel %vm1255_vm1, %v2157_v7, 0.0 }
 0x3ed   : > { %v2161_v13 = vpop.eup %2160  ;;  %v1322_v14 = vsel %vm1255_vm1, %v2159_v10, 0.0 }
 0x3ee   : > { %v1319_v12 = vadd.f32 %v1318_v9, %v1317_v8  ;;  %v2163_v16 = vpop.eup %2162  ;;  %v1324_v17 = vsel %vm1255_vm1, %v2161_v13, 0.0 }
 0x3ef   : > { %v1326_v20 = vsel %vm1255_vm1, %v2163_v16, 0.0 }
 0x3f0   : > { %v1321_v15 = vadd.f32 %v1320_v6, %v1319_v12  ;;  %1339 = vxpose.xlu0.b32.cont [3/8] (short) (narrow) %v2153_v1, 8 }
 0x3f2   : > { %v1323_v19 = vadd.f32 %v1322_v14, %v1321_v15 }
 0x3f4   : > { %v1325_v18 = vadd.f32 %v1324_v17, %v1323_v19  ;;  %1340 = vxpose.xlu0.b32.cont [4/8] (short) (narrow) %v2155_v3, 8 }
 0x3f6   : > { %v1327_v11 = vadd.f32 %v1326_v20, %v1325_v18 }
 0x3f8   : > { %v1328_v21 = vrot.slane %v1327_v11, 4  ;;  %1341 = vxpose.xlu0.b32.cont [5/8] (short) (narrow) %v2157_v7, 8 }
 0x3fa   : > { %v1329_v22 = vadd.f32 %v1328_v21, %v1327_v11 }
 0x3fc   : > { %v1330_v25 = vrot.slane %v1329_v22, 2  ;;  %1342 = vxpose.xlu0.b32.cont [6/8] (short) (narrow) %v2159_v10, 8 }
 0x3fe   : > { %v1331_v23 = vadd.f32 %v1330_v25, %v1329_v22 }
 0x400   : > { %v1332_v26 = vrot.slane %v1331_v23, 1  ;;  %1343 = vxpose.xlu0.b32.cont [7/8] (short) (narrow) %v2161_v13, 8 }
 0x402   : > { %v1333_v28 = vadd.f32 %v1332_v26, %v1331_v23 }
 0x404   : > { %v1334_v29 = vadd.f32 %v1333_v28, %v1312_v27  ;;  %1344 = vxpose.xlu0.b32.end [8/8] (short) (narrow) %v2163_v16, 8 }
 0x406   : > { %1336 = vst.msk [vmem:[#allocation4] sm:$0x1] %vm626_vm0, %v1334_v29 }
 0x40d   : > { %v1461_v30 = vld [vmem:[#allocation4] sm:$0x1] }
 0x40e   : > { %1464 = vperm.xlu1 %2113, %v1461_v30  }
 0x465   : > { %v1447_v32 = vpop.permute.xlu1 %1446 }
 0x466   : > { %v1452_v34 = vrot.slane %v1447_v32, %v2706_v40 }
 0x468   : > { %v1353_v31 = vpop.trf.xlu0  ;;  %v1453_v37 = vmul.f32 %v1452_v34, %v1443_v36 }
 0x469   : > { %1910 = vmatmul.mubr.msk.f32.vlgmr.msra.gmra.mrb[16].mxu0 %vm1369_vm3, %v1353_v31 }
 0x48d   : > { %v1465_v33 = vpop.permute.xlu1 %1464 }
 0x48e   : > { %v1470_v35 = vrot.slane %v1465_v33, %v2706_v40 }
 0x490   : > { %2164 = vrcp.f32 %v1470_v35 }
 0x49a   : > { %v2165_v42 = vpop.eup %2164 }
 0x53c   : > { %v1439_v38 = vpop.f32.mrb[16].mxu0 }
 0x53d   : > { %v1454_v39 = vadd.f32 %v1453_v37, %v1439_v38  ;;  %v1911_v41 = vpop.f32.mrb[17].mxu0 }
 0x53f   : > { %1455 = vst [vmem:[#allocation5] sm:$0x1] %v1454_v39 }
 0x546   : > { %v1460_v43 = vld [vmem:[#allocation5] sm:$0x1] }
 0x547   : > { %v1472_v44 = vmul.f32 %v2165_v42, %v1460_v43 }
 0x549   : > { %1473 = vst [vmem:[%s427_s14] sm:$0x1] %v1472_v44 }
 0x54a   : > { %2179 = shalt.err (!%p2176_p5)
}
 0x54b   : > { %s2180_s25 = scalar_lea.hbm %s2727_s23, 16  ;;  %s2184_s13 = scalar_lea.hbm %s2785_s11, 32 }
 0x54c   : > { %p2181_p6 = scmp.ne.s32.totalorder %s2727_s23, %s2180_s25  ;;  %p2185_p10 = scmp.lt.u32.totalorder %s2727_s23, %s2785_s11 }
 0x54d   : > { %p2186_p11 = scmp.lt.u32.totalorder %s2184_s13, %s2180_s25  ;;  %p2188_p13 = scmp.lt.u32.totalorder %s2180_s25, %s2727_s23 }
 0x54e   : > { %p2182_p7 = pnand %p2181_p6, %p2352_p4 }
 0x54f   : > { %p2187_p12 = por %p2186_p11, %p2185_p10 }
 0x550   : > { %p2183_p9 = pneg %p2182_p7 }
 0x551   : > { %p2189_p0 = por %p2188_p13, %p2187_p12 }
 0x553   : > { %p2190_p1 = pnand %p2189_p0, %p2183_p9 }
 0x555   : > { %2193 = shalt.err (!%p2190_p1)
}
 0x556   : > { %2052 = dma.vmem_to_hbm [thread:$0]  (%p2352_p4), %s2729_s21, 16, %s2727_s23, %s1475_s19  }
 0x557 PF: > { %p2058_p2 = scmp.ge.s32.totalorder %s2244_s22, 2  ;;  %s1499_s16 = sand.u32 1, %s2224_s17  }
 0x558   : > { %s1500_s24 = scalar_lea.sflag [#allocation7], %s1499_s16 }
 0x559   : > { %p2055_p3 = pnand %p2058_p2, %p2359_p8 }
 0x55b   : > { %2219 = dma.done.wait (!%p2055_p3), %s1500_s24, 16  }
 0x55c   : > { %2221 = vsyncadd (!%p2055_p3), %s1500_s24, 4294967280  ;;  %s24_s22 = sadd.s32 1, %s2244_s22   ;;  %s2795_s20 = sld [smem:[#allocation9_spill]] }
 0x55d   : > { %p21_p5 = scmp.ge.s32.totalorder %s24_s22, 4   ;;  %s2796_s19 = sld [smem:[#allocation12_spill]] }
 0x55e   : > { %s2797_s27 = sld [smem:[#allocation10_spill]]  ;;  %s2798_s21 = sld [smem:[#allocation11_spill]] }
 0x55f   : > { %s2799_s17 = smov %s2228_s18  ;;  %23 = sbr.rel (!%p21_p5) target bundleno = 4 (0x4), region = 113 }
 0x562   : > { %s2800_s18 = smov %s2795_s20 }
 0x564   : > { %s2801_s20 = smov %s2797_s27 }
 0x566   :  { %1504 = vsyncpa [#allocation7], 1 }
 0x567   :  { %1506 = vsyncpa [#allocation7 + $0x1], 1 }

</bundles_post_ra>
